<compile_context>
chip_gen: v7x
topology: tpu7x:2x2x1
jax: 0.10.0
libtpu: 0.0.40
codegen_flags: <defaults>
</compile_context>

<pallas_src>
import jax
import jax.numpy as jnp
from jax.experimental import pallas as pl
from jax.experimental.pallas import tpu as pltpu


# ----------------------------------------------------------------------------
# Fused Pallas kernel: all RGCN layers + BatchNorm(batch stats) + residual
# ----------------------------------------------------------------------------
def make_rgcn_forward_kernel(num_layers, num_rels):
    R = num_rels
    L = num_layers

    def kernel(*refs):
        # refs = [a_cat, feat, (w_rel, w_self, bias) * L, gamma, beta, out]
        a_ref, feat_ref = refs[0], refs[1]
        layer_refs = refs[2:2 + 3 * L]
        gamma_ref = refs[2 + 3 * L]
        beta_ref = refs[3 + 3 * L]
        o_ref = refs[4 + 3 * L]

        a_cat = a_ref[...]                      # (N, R*N), edge norm baked in
        n_nodes = a_cat.shape[0]

        h = feat_ref[...]                       # (N, inp_dim)
        h_in = h                                # input to the current layer

        for l in range(L):
            w_ref, wself_ref, b_ref = layer_refs[3 * l:3 * l + 3]
            h_in = h                            # matches `h_in = g.ndata['h']`

            # Message projection per relation: hw_r = H @ W[r], stacked vertically
            # so the aggregation becomes one lane/K-dense matmul with K = R*N.
            hw_v = jnp.concatenate(
                [jnp.dot(h, w_ref[r], preferred_element_type=jnp.float32)
                 for r in range(R)],
                axis=0,
            )                                   # (R*N, d_out)

            # sum_r A[r] @ (H @ W[r])  ==  A_cat @ vstack_r(H @ W[r])
            agg = jnp.dot(a_cat, hw_v, preferred_element_type=jnp.float32)

            # self-loop + bias, then ReLU
            agg = agg + jnp.dot(h, wself_ref[...],
                                preferred_element_type=jnp.float32) + b_ref[...]
            h = jnp.maximum(agg, 0.0)

        # BatchNorm1d over the node batch (training-mode batch statistics, eps=1e-5)
        # followed by the residual with the input to the last layer.
        mean = jnp.sum(h, axis=0, keepdims=True) / n_nodes
        diff = h - mean
        var = jnp.sum(diff * diff, axis=0, keepdims=True) / n_nodes
        hn = diff * jax.lax.rsqrt(var + 1e-5)
        o_ref[...] = h_in + hn * gamma_ref[...] + beta_ref[...]

    return kernel


def rgcn1_forward(adj, feat, layers, gamma, beta):
    """Mirrors RGCN_1.forward: h_in = input to the last layer; out = h_in + BN(h_last)."""
    R, N, _ = adj.shape
    assert len(layers) >= 2, "RGCN_1.forward requires at least 2 layers (h_in residual)"
    emb_dim = layers[-1][0].shape[-1]

    # Layout prep (glue): horizontal concat of per-relation adjacency -> (N, R*N).
    a_cat = jnp.transpose(adj, (1, 0, 2)).reshape(N, R * N)

    args = [a_cat, feat]
    for (w_rel, w_self, bias) in layers:
        args += [w_rel, w_self, bias]
    args += [gamma, beta]

    vmem = pl.BlockSpec(memory_space=pltpu.MemorySpace.VMEM)
    kernel = make_rgcn_forward_kernel(len(layers), R)

    return pl.pallas_call(
        kernel,
        out_shape=jax.ShapeDtypeStruct((N, emb_dim), jnp.float32),
        in_specs=[vmem] * len(args),
        out_specs=vmem,
    )(*args)


# ----------------------------------------------------------------------------
# Parameter setup (plain JAX glue)
# ----------------------------------------------------------------------------
def init_params(key, num_layers, inp_dim, emb_dim, num_rels, num_bases):
    layers = []
    for l in range(num_layers):
        d_in = inp_dim if l == 0 else emb_dim
        key, k1, k2, k3 = jax.random.split(key, 4)
        bases = 0.1 * jax.random.normal(k1, (num_bases, d_in, emb_dim), jnp.float32)
        comp = 0.1 * jax.random.normal(k2, (num_rels, num_bases), jnp.float32)
        # basis decomposition W_r = sum_b comp[r, b] * bases[b]
        w_rel = jnp.einsum("rb,bio->rio", comp, bases)
        w_self = 0.1 * jax.random.normal(k3, (d_in, emb_dim), jnp.float32)
        bias = jnp.zeros((1, emb_dim), jnp.float32)
        layers.append((w_rel, w_self, bias))
    gamma = jnp.ones((1, emb_dim), jnp.float32)
    beta = jnp.zeros((1, emb_dim), jnp.float32)
    return layers, gamma, beta


# ----------------------------------------------------------------------------
# Pure-JAX reference (for correctness check)
# ----------------------------------------------------------------------------
def _layer_ref(adj, h, w_rel, w_self, bias):
    msg = jnp.einsum("rnm,md->rnd", adj, h)
    agg = jnp.einsum("rnd,rde->ne", msg, w_rel)
    return jax.nn.relu(agg + h @ w_self + bias)


def _forward_ref(adj, feat, layers, gamma, beta):
    h, h_in = None, None
    for idx, (w_rel, w_self, bias) in enumerate(layers):
        if h is not None:
            h_in = h
        x = feat if idx == 0 else h
        h = _layer_ref(adj, x, w_rel, w_self, bias)
    mean = h.mean(axis=0, keepdims=True)
    var = ((h - mean) ** 2).mean(axis=0, keepdims=True)
    hn = (h - mean) / jnp.sqrt(var + 1e-5)
    return h_in + hn * gamma + beta


# ----------------------------------------------------------------------------
if __name__ == "__main__":
    N = 64            # number of nodes in the (sub)graph
    INP_DIM = 32      # params.inp_dim
    EMB_DIM = 32      # params.emb_dim
    NUM_RELS = 4      # params.aug_num_rels
    NUM_BASES = 2     # params.num_bases
    NUM_LAYERS = 3    # params.num_gcn_layers

    key = jax.random.PRNGKey(0)
    k_adj, k_param = jax.random.split(key)

    # dense per-relation adjacency with edge norm (1 / in-degree) baked in
    adj_bin = (jax.random.uniform(k_adj, (NUM_RELS, N, N)) < 0.1).astype(jnp.float32)
    in_deg = jnp.clip(adj_bin.sum(axis=(0, 2)), 1.0, None)          # (N,) per destination
    adj = adj_bin / in_deg[None, :, None]

    # input-layer features: dense equivalent of the GraIL id-embedding lookup
    # (create_features = arange(inp_dim)  ->  one-hot node-id features)
    feat = jnp.eye(INP_DIM, dtype=jnp.float32)[jnp.arange(N) % INP_DIM]

    layers, gamma, beta = init_params(k_param, NUM_LAYERS, INP_DIM, EMB_DIM,
                                      NUM_RELS, NUM_BASES)

    fwd = jax.jit(rgcn1_forward)
    out = fwd(adj, feat, layers, gamma, beta)
    out = jax.block_until_ready(out)

    ref = _forward_ref(adj, feat, layers, gamma, beta)
    assert out.shape == (N, EMB_DIM)
    assert jnp.allclose(out, ref, atol=1e-3, rtol=1e-3), "mismatch vs JAX reference"

    print("KERNEL_OK")
</pallas_src>

<mosaic_0001>
module attributes {stable_mosaic.version = 11 : i64} {
  func.func @kernel(%arg0: memref<64x256xf32, #tpu.memory_space<vmem>>, %arg1: memref<64x32xf32, #tpu.memory_space<vmem>>, %arg2: memref<4x32x32xf32, #tpu.memory_space<vmem>>, %arg3: memref<32x32xf32, #tpu.memory_space<vmem>>, %arg4: memref<1x32xf32, #tpu.memory_space<vmem>>, %arg5: memref<4x32x32xf32, #tpu.memory_space<vmem>>, %arg6: memref<32x32xf32, #tpu.memory_space<vmem>>, %arg7: memref<1x32xf32, #tpu.memory_space<vmem>>, %arg8: memref<4x32x32xf32, #tpu.memory_space<vmem>>, %arg9: memref<32x32xf32, #tpu.memory_space<vmem>>, %arg10: memref<1x32xf32, #tpu.memory_space<vmem>>, %arg11: memref<1x32xf32, #tpu.memory_space<vmem>>, %arg12: memref<1x32xf32, #tpu.memory_space<vmem>>, %arg13: memref<64x32xf32, #tpu.memory_space<vmem>>) attributes {dimension_semantics = [], scalar_prefetch = 0 : i64, scratch_operands = 0 : i64, tpu.core_type = #tpu.core_type<tc>} {
    %c0 = arith.constant 0 : index
    %c0_0 = arith.constant 0 : index
    %0 = vector.load %arg0[%c0, %c0_0] : memref<64x256xf32, #tpu.memory_space<vmem>>, vector<64x256xf32>
    %c0_1 = arith.constant 0 : index
    %c0_2 = arith.constant 0 : index
    %1 = vector.load %arg1[%c0_1, %c0_2] : memref<64x32xf32, #tpu.memory_space<vmem>>, vector<64x32xf32>
    %c0_3 = arith.constant 0 : index
    %c0_4 = arith.constant 0 : index
    %c0_5 = arith.constant 0 : index
    %2 = vector.load %arg2[%c0_3, %c0_4, %c0_5] : memref<4x32x32xf32, #tpu.memory_space<vmem>>, vector<1x32x32xf32>
    %3 = vector.shape_cast %2 : vector<1x32x32xf32> to vector<32x32xf32>
    %cst = arith.constant dense<0.000000e+00> : vector<64x32xf32>
    %4 = tpu.matmul %1, %3, %cst {dimension_numbers = #tpu.dot_dimension_numbers<[1], [0], [0], [1], [0, 0, 1, 1], [], []>} : vector<64x32xf32>, vector<32x32xf32>, vector<64x32xf32> -> vector<64x32xf32>
    %c1 = arith.constant 1 : index
    %c0_6 = arith.constant 0 : index
    %c0_7 = arith.constant 0 : index
    %5 = vector.load %arg2[%c1, %c0_6, %c0_7] : memref<4x32x32xf32, #tpu.memory_space<vmem>>, vector<1x32x32xf32>
    %6 = vector.shape_cast %5 : vector<1x32x32xf32> to vector<32x32xf32>
    %cst_8 = arith.constant dense<0.000000e+00> : vector<64x32xf32>
    %7 = tpu.matmul %1, %6, %cst_8 {dimension_numbers = #tpu.dot_dimension_numbers<[1], [0], [0], [1], [0, 0, 1, 1], [], []>} : vector<64x32xf32>, vector<32x32xf32>, vector<64x32xf32> -> vector<64x32xf32>
    %c2 = arith.constant 2 : index
    %c0_9 = arith.constant 0 : index
    %c0_10 = arith.constant 0 : index
    %8 = vector.load %arg2[%c2, %c0_9, %c0_10] : memref<4x32x32xf32, #tpu.memory_space<vmem>>, vector<1x32x32xf32>
    %9 = vector.shape_cast %8 : vector<1x32x32xf32> to vector<32x32xf32>
    %cst_11 = arith.constant dense<0.000000e+00> : vector<64x32xf32>
    %10 = tpu.matmul %1, %9, %cst_11 {dimension_numbers = #tpu.dot_dimension_numbers<[1], [0], [0], [1], [0, 0, 1, 1], [], []>} : vector<64x32xf32>, vector<32x32xf32>, vector<64x32xf32> -> vector<64x32xf32>
    %c3 = arith.constant 3 : index
    %c0_12 = arith.constant 0 : index
    %c0_13 = arith.constant 0 : index
    %11 = vector.load %arg2[%c3, %c0_12, %c0_13] : memref<4x32x32xf32, #tpu.memory_space<vmem>>, vector<1x32x32xf32>
    %12 = vector.shape_cast %11 : vector<1x32x32xf32> to vector<32x32xf32>
    %cst_14 = arith.constant dense<0.000000e+00> : vector<64x32xf32>
    %13 = tpu.matmul %1, %12, %cst_14 {dimension_numbers = #tpu.dot_dimension_numbers<[1], [0], [0], [1], [0, 0, 1, 1], [], []>} : vector<64x32xf32>, vector<32x32xf32>, vector<64x32xf32> -> vector<64x32xf32>
    %14 = tpu.concatenate %4, %7, %10, %13 in 0 : vector<64x32xf32>, vector<64x32xf32>, vector<64x32xf32>, vector<64x32xf32> -> vector<256x32xf32>
    %cst_15 = arith.constant dense<0.000000e+00> : vector<64x32xf32>
    %15 = tpu.matmul %0, %14, %cst_15 {dimension_numbers = #tpu.dot_dimension_numbers<[1], [0], [0], [1], [0, 0, 1, 1], [], []>} : vector<64x256xf32>, vector<256x32xf32>, vector<64x32xf32> -> vector<64x32xf32>
    %c0_16 = arith.constant 0 : index
    %c0_17 = arith.constant 0 : index
    %16 = vector.load %arg3[%c0_16, %c0_17] : memref<32x32xf32, #tpu.memory_space<vmem>>, vector<32x32xf32>
    %cst_18 = arith.constant dense<0.000000e+00> : vector<64x32xf32>
    %17 = tpu.matmul %1, %16, %cst_18 {dimension_numbers = #tpu.dot_dimension_numbers<[1], [0], [0], [1], [0, 0, 1, 1], [], []>} : vector<64x32xf32>, vector<32x32xf32>, vector<64x32xf32> -> vector<64x32xf32>
    %18 = arith.addf %15, %17 : vector<64x32xf32>
    %c0_19 = arith.constant 0 : index
    %c0_20 = arith.constant 0 : index
    %19 = vector.load %arg4[%c0_19, %c0_20] : memref<1x32xf32, #tpu.memory_space<vmem>>, vector<1x32xf32>
    %20 = vector.broadcast %19 : vector<1x32xf32> to vector<64x32xf32>
    %21 = arith.addf %18, %20 : vector<64x32xf32>
    %cst_21 = arith.constant 0.000000e+00 : f32
    %22 = vector.broadcast %cst_21 : f32 to vector<64x32xf32>
    %23 = arith.maximumf %21, %22 : vector<64x32xf32>
    %c0_22 = arith.constant 0 : index
    %c0_23 = arith.constant 0 : index
    %c0_24 = arith.constant 0 : index
    %24 = vector.load %arg5[%c0_22, %c0_23, %c0_24] : memref<4x32x32xf32, #tpu.memory_space<vmem>>, vector<1x32x32xf32>
    %25 = vector.shape_cast %24 : vector<1x32x32xf32> to vector<32x32xf32>
    %cst_25 = arith.constant dense<0.000000e+00> : vector<64x32xf32>
    %26 = tpu.matmul %23, %25, %cst_25 {dimension_numbers = #tpu.dot_dimension_numbers<[1], [0], [0], [1], [0, 0, 1, 1], [], []>} : vector<64x32xf32>, vector<32x32xf32>, vector<64x32xf32> -> vector<64x32xf32>
    %c1_26 = arith.constant 1 : index
    %c0_27 = arith.constant 0 : index
    %c0_28 = arith.constant 0 : index
    %27 = vector.load %arg5[%c1_26, %c0_27, %c0_28] : memref<4x32x32xf32, #tpu.memory_space<vmem>>, vector<1x32x32xf32>
    %28 = vector.shape_cast %27 : vector<1x32x32xf32> to vector<32x32xf32>
    %cst_29 = arith.constant dense<0.000000e+00> : vector<64x32xf32>
    %29 = tpu.matmul %23, %28, %cst_29 {dimension_numbers = #tpu.dot_dimension_numbers<[1], [0], [0], [1], [0, 0, 1, 1], [], []>} : vector<64x32xf32>, vector<32x32xf32>, vector<64x32xf32> -> vector<64x32xf32>
    %c2_30 = arith.constant 2 : index
    %c0_31 = arith.constant 0 : index
    %c0_32 = arith.constant 0 : index
    %30 = vector.load %arg5[%c2_30, %c0_31, %c0_32] : memref<4x32x32xf32, #tpu.memory_space<vmem>>, vector<1x32x32xf32>
    %31 = vector.shape_cast %30 : vector<1x32x32xf32> to vector<32x32xf32>
    %cst_33 = arith.constant dense<0.000000e+00> : vector<64x32xf32>
    %32 = tpu.matmul %23, %31, %cst_33 {dimension_numbers = #tpu.dot_dimension_numbers<[1], [0], [0], [1], [0, 0, 1, 1], [], []>} : vector<64x32xf32>, vector<32x32xf32>, vector<64x32xf32> -> vector<64x32xf32>
    %c3_34 = arith.constant 3 : index
    %c0_35 = arith.constant 0 : index
    %c0_36 = arith.constant 0 : index
    %33 = vector.load %arg5[%c3_34, %c0_35, %c0_36] : memref<4x32x32xf32, #tpu.memory_space<vmem>>, vector<1x32x32xf32>
    %34 = vector.shape_cast %33 : vector<1x32x32xf32> to vector<32x32xf32>
    %cst_37 = arith.constant dense<0.000000e+00> : vector<64x32xf32>
    %35 = tpu.matmul %23, %34, %cst_37 {dimension_numbers = #tpu.dot_dimension_numbers<[1], [0], [0], [1], [0, 0, 1, 1], [], []>} : vector<64x32xf32>, vector<32x32xf32>, vector<64x32xf32> -> vector<64x32xf32>
    %36 = tpu.concatenate %26, %29, %32, %35 in 0 : vector<64x32xf32>, vector<64x32xf32>, vector<64x32xf32>, vector<64x32xf32> -> vector<256x32xf32>
    %cst_38 = arith.constant dense<0.000000e+00> : vector<64x32xf32>
    %37 = tpu.matmul %0, %36, %cst_38 {dimension_numbers = #tpu.dot_dimension_numbers<[1], [0], [0], [1], [0, 0, 1, 1], [], []>} : vector<64x256xf32>, vector<256x32xf32>, vector<64x32xf32> -> vector<64x32xf32>
    %c0_39 = arith.constant 0 : index
    %c0_40 = arith.constant 0 : index
    %38 = vector.load %arg6[%c0_39, %c0_40] : memref<32x32xf32, #tpu.memory_space<vmem>>, vector<32x32xf32>
    %cst_41 = arith.constant dense<0.000000e+00> : vector<64x32xf32>
    %39 = tpu.matmul %23, %38, %cst_41 {dimension_numbers = #tpu.dot_dimension_numbers<[1], [0], [0], [1], [0, 0, 1, 1], [], []>} : vector<64x32xf32>, vector<32x32xf32>, vector<64x32xf32> -> vector<64x32xf32>
    %40 = arith.addf %37, %39 : vector<64x32xf32>
    %c0_42 = arith.constant 0 : index
    %c0_43 = arith.constant 0 : index
    %41 = vector.load %arg7[%c0_42, %c0_43] : memref<1x32xf32, #tpu.memory_space<vmem>>, vector<1x32xf32>
    %42 = vector.broadcast %41 : vector<1x32xf32> to vector<64x32xf32>
    %43 = arith.addf %40, %42 : vector<64x32xf32>
    %cst_44 = arith.constant 0.000000e+00 : f32
    %44 = vector.broadcast %cst_44 : f32 to vector<64x32xf32>
    %45 = arith.maximumf %43, %44 : vector<64x32xf32>
    %c0_45 = arith.constant 0 : index
    %c0_46 = arith.constant 0 : index
    %c0_47 = arith.constant 0 : index
    %46 = vector.load %arg8[%c0_45, %c0_46, %c0_47] : memref<4x32x32xf32, #tpu.memory_space<vmem>>, vector<1x32x32xf32>
    %47 = vector.shape_cast %46 : vector<1x32x32xf32> to vector<32x32xf32>
    %cst_48 = arith.constant dense<0.000000e+00> : vector<64x32xf32>
    %48 = tpu.matmul %45, %47, %cst_48 {dimension_numbers = #tpu.dot_dimension_numbers<[1], [0], [0], [1], [0, 0, 1, 1], [], []>} : vector<64x32xf32>, vector<32x32xf32>, vector<64x32xf32> -> vector<64x32xf32>
    %c1_49 = arith.constant 1 : index
    %c0_50 = arith.constant 0 : index
    %c0_51 = arith.constant 0 : index
    %49 = vector.load %arg8[%c1_49, %c0_50, %c0_51] : memref<4x32x32xf32, #tpu.memory_space<vmem>>, vector<1x32x32xf32>
    %50 = vector.shape_cast %49 : vector<1x32x32xf32> to vector<32x32xf32>
    %cst_52 = arith.constant dense<0.000000e+00> : vector<64x32xf32>
    %51 = tpu.matmul %45, %50, %cst_52 {dimension_numbers = #tpu.dot_dimension_numbers<[1], [0], [0], [1], [0, 0, 1, 1], [], []>} : vector<64x32xf32>, vector<32x32xf32>, vector<64x32xf32> -> vector<64x32xf32>
    %c2_53 = arith.constant 2 : index
    %c0_54 = arith.constant 0 : index
    %c0_55 = arith.constant 0 : index
    %52 = vector.load %arg8[%c2_53, %c0_54, %c0_55] : memref<4x32x32xf32, #tpu.memory_space<vmem>>, vector<1x32x32xf32>
    %53 = vector.shape_cast %52 : vector<1x32x32xf32> to vector<32x32xf32>
    %cst_56 = arith.constant dense<0.000000e+00> : vector<64x32xf32>
    %54 = tpu.matmul %45, %53, %cst_56 {dimension_numbers = #tpu.dot_dimension_numbers<[1], [0], [0], [1], [0, 0, 1, 1], [], []>} : vector<64x32xf32>, vector<32x32xf32>, vector<64x32xf32> -> vector<64x32xf32>
    %c3_57 = arith.constant 3 : index
    %c0_58 = arith.constant 0 : index
    %c0_59 = arith.constant 0 : index
    %55 = vector.load %arg8[%c3_57, %c0_58, %c0_59] : memref<4x32x32xf32, #tpu.memory_space<vmem>>, vector<1x32x32xf32>
    %56 = vector.shape_cast %55 : vector<1x32x32xf32> to vector<32x32xf32>
    %cst_60 = arith.constant dense<0.000000e+00> : vector<64x32xf32>
    %57 = tpu.matmul %45, %56, %cst_60 {dimension_numbers = #tpu.dot_dimension_numbers<[1], [0], [0], [1], [0, 0, 1, 1], [], []>} : vector<64x32xf32>, vector<32x32xf32>, vector<64x32xf32> -> vector<64x32xf32>
    %58 = tpu.concatenate %48, %51, %54, %57 in 0 : vector<64x32xf32>, vector<64x32xf32>, vector<64x32xf32>, vector<64x32xf32> -> vector<256x32xf32>
    %cst_61 = arith.constant dense<0.000000e+00> : vector<64x32xf32>
    %59 = tpu.matmul %0, %58, %cst_61 {dimension_numbers = #tpu.dot_dimension_numbers<[1], [0], [0], [1], [0, 0, 1, 1], [], []>} : vector<64x256xf32>, vector<256x32xf32>, vector<64x32xf32> -> vector<64x32xf32>
    %c0_62 = arith.constant 0 : index
    %c0_63 = arith.constant 0 : index
    %60 = vector.load %arg9[%c0_62, %c0_63] : memref<32x32xf32, #tpu.memory_space<vmem>>, vector<32x32xf32>
    %cst_64 = arith.constant dense<0.000000e+00> : vector<64x32xf32>
    %61 = tpu.matmul %45, %60, %cst_64 {dimension_numbers = #tpu.dot_dimension_numbers<[1], [0], [0], [1], [0, 0, 1, 1], [], []>} : vector<64x32xf32>, vector<32x32xf32>, vector<64x32xf32> -> vector<64x32xf32>
    %62 = arith.addf %59, %61 : vector<64x32xf32>
    %c0_65 = arith.constant 0 : index
    %c0_66 = arith.constant 0 : index
    %63 = vector.load %arg10[%c0_65, %c0_66] : memref<1x32xf32, #tpu.memory_space<vmem>>, vector<1x32xf32>
    %64 = vector.broadcast %63 : vector<1x32xf32> to vector<64x32xf32>
    %65 = arith.addf %62, %64 : vector<64x32xf32>
    %cst_67 = arith.constant 0.000000e+00 : f32
    %66 = vector.broadcast %cst_67 : f32 to vector<64x32xf32>
    %67 = arith.maximumf %65, %66 : vector<64x32xf32>
    %cst_68 = arith.constant dense<0.000000e+00> : vector<32xf32>
    %68 = vector.multi_reduction <add>, %67, %cst_68 [0] : vector<64x32xf32> to vector<32xf32>
    %69 = vector.shape_cast %68 : vector<32xf32> to vector<1x32xf32>
    %cst_69 = arith.constant 6.400000e+01 : f32
    %70 = vector.broadcast %cst_69 : f32 to vector<1x32xf32>
    %71 = arith.divf %69, %70 : vector<1x32xf32>
    %72 = vector.broadcast %71 : vector<1x32xf32> to vector<64x32xf32>
    %73 = arith.subf %67, %72 : vector<64x32xf32>
    %74 = arith.mulf %73, %73 : vector<64x32xf32>
    %cst_70 = arith.constant dense<0.000000e+00> : vector<32xf32>
    %75 = vector.multi_reduction <add>, %74, %cst_70 [0] : vector<64x32xf32> to vector<32xf32>
    %76 = vector.shape_cast %75 : vector<32xf32> to vector<1x32xf32>
    %cst_71 = arith.constant 6.400000e+01 : f32
    %77 = vector.broadcast %cst_71 : f32 to vector<1x32xf32>
    %78 = arith.divf %76, %77 : vector<1x32xf32>
    %cst_72 = arith.constant 9.99999974E-6 : f32
    %79 = vector.broadcast %cst_72 : f32 to vector<1x32xf32>
    %80 = arith.addf %78, %79 : vector<1x32xf32>
    %81 = math.rsqrt %80 : vector<1x32xf32>
    %82 = vector.broadcast %81 : vector<1x32xf32> to vector<64x32xf32>
    %83 = arith.mulf %73, %82 : vector<64x32xf32>
    %c0_73 = arith.constant 0 : index
    %c0_74 = arith.constant 0 : index
    %84 = vector.load %arg11[%c0_73, %c0_74] : memref<1x32xf32, #tpu.memory_space<vmem>>, vector<1x32xf32>
    %85 = vector.broadcast %84 : vector<1x32xf32> to vector<64x32xf32>
    %86 = arith.mulf %83, %85 : vector<64x32xf32>
    %87 = arith.addf %45, %86 : vector<64x32xf32>
    %c0_75 = arith.constant 0 : index
    %c0_76 = arith.constant 0 : index
    %88 = vector.load %arg12[%c0_75, %c0_76] : memref<1x32xf32, #tpu.memory_space<vmem>>, vector<1x32xf32>
    %89 = vector.broadcast %88 : vector<1x32xf32> to vector<64x32xf32>
    %90 = arith.addf %87, %89 : vector<64x32xf32>
    %c0_77 = arith.constant 0 : index
    %c0_78 = arith.constant 0 : index
    %91 = vector.load %arg13[%c0_77, %c0_78] : memref<64x32xf32, #tpu.memory_space<vmem>>, vector<64x32xf32>
    tpu.vector_store %arg13[%c0_77, %c0_78], %90 {strides = array<i32>} : memref<64x32xf32, #tpu.memory_space<vmem>>, vector<64x32xf32>,
    return
  }
}

</mosaic_0001>

<bundles_post_ra>
// kernel: rgcn1_forward.1
= control target key start
LH: loop header
LB: loop body
LE: loop exit
PB: predicated region body
PF: predicated region fallthrough
CT: control target
= control target key end

     0   :  { %vm72_vm0 = vcmask 261120   ;;  %s4074_s2 = inlined_call_operand.vmem [shape: f32[4,32,32], index: 2, kind: input, shape index: {}]   ;;  %s4075_s1 = inlined_call_operand.vmem [shape: f32[64,32], index: 1, kind: input, shape index: {}]   ;;  %s4076_s3 = inlined_call_operand.vmem [shape: f32[32,32], index: 3, kind: input, shape index: {}]   ;;  %s4077_s0 = inlined_call_operand.vmem [shape: f32[64,256], index: 0, kind: input, shape index: {}]   ;;  %s4078_s5 = inlined_call_operand.vmem [shape: f32[4,32,32], index: 5, kind: input, shape index: {}]   ;;  %s4079_s4 = inlined_call_operand.vmem [shape: f32[1,32], index: 4, kind: input, shape index: {}]   ;;  %s4080_s6 = inlined_call_operand.vmem [shape: f32[32,32], index: 6, kind: input, shape index: {}]   ;;  %s4081_s8 = inlined_call_operand.vmem [shape: f32[4,32,32], index: 8, kind: input, shape index: {}]   ;;  %s4082_s7 = inlined_call_operand.vmem [shape: f32[1,32], index: 7, kind: input, shape index: {}]   ;;  %s4083_s9 = inlined_call_operand.vmem [shape: f32[32,32], index: 9, kind: input, shape index: {}]   ;;  %s4084_s10 = inlined_call_operand.vmem [shape: f32[1,32], index: 10, kind: input, shape index: {}]   ;;  %s4085_s11 = inlined_call_operand.vmem [shape: f32[1,32], index: 11, kind: input, shape index: {}]   ;;  %s4086_s12 = inlined_call_operand.vmem [shape: f32[1,32], index: 12, kind: input, shape index: {}]   ;;  %s4087_s13 = inlined_call_operand.vmem [shape: f32[64,32], index: 13, kind: output, shape index: {}]  }
   0x1   :  { %v68_v0 = vld [vmem:[%s4074_s2] sm:$0xff]  ;;  %v69_v1 = vld [vmem:[%s4074_s2 + $0x8] sm:$0xff]  ;;  %v70_v2 = vld [vmem:[%s4074_s2 + $0x10] sm:$0xff] }
   0x2   :  { %v3099_v3 = vpack.c.bf16 %v69_v1, %v68_v0  ;;  %v71_v4 = vld [vmem:[%s4074_s2 + $0x18] sm:$0xff]  ;;  %v3402_v5 = vld [vmem:[%s4075_s1] sm:$0xff]  ;;  %v2299_v8 = vld [vmem:[%s4074_s2 + $0x28] sm:$0xff] }
   0x3   :  { %v3103_v6 = vpack.c.bf16 %v71_v4, %v70_v2  ;;  %2807 = vmatprep.mubr.msk.f32.mxu0 %vm72_vm0, %v3402_v5  ;;  %v2298_v7 = vld [vmem:[%s4074_s2 + $0x20] sm:$0xff]  ;;  %2867 = vmatprep.mubr.msk.f32.mxu1 %vm72_vm0, %v3402_v5  ;;  %v2300_v10 = vld [vmem:[%s4074_s2 + $0x30] sm:$0xff]  ;;  %v2301_v11 = vld [vmem:[%s4074_s2 + $0x38] sm:$0xff] }
   0x4   :  { %3100 = vmatprep.subr.bf16.mxu0 %v3099_v3  ;;  %v3107_v9 = vpack.c.bf16 %v2299_v8, %v2298_v7  ;;  %v2322_v12 = vld [vmem:[%s4074_s2 + $0x60] sm:$0xff]  ;;  %v2323_v13 = vld [vmem:[%s4074_s2 + $0x68] sm:$0xff]  ;;  %v2324_v14 = vld [vmem:[%s4074_s2 + $0x70] sm:$0xff]  ;;  %v3111_v19 = vpack.c.bf16 %v2301_v11, %v2300_v10 }
   0x5   :  { %3102 = vmatpush3.bf16.msra.mxu0 %v3099_v3  ;;  %v2325_v15 = vld [vmem:[%s4074_s2 + $0x78] sm:$0xff]  ;;  %v3435_v16 = vld [vmem:[%s4075_s1 + $0x8] sm:$0xff]  ;;  %v3123_v17 = vpack.c.bf16 %v2323_v13, %v2322_v12  ;;  %v3440_v18 = vld [vmem:[%s4075_s1 + $0x10] sm:$0xff] }
   0x6   :  { %3104 = vmatprep.subr.bf16.mxu0 %v3103_v6  ;;  %v3127_v20 = vpack.c.bf16 %v2325_v15, %v2324_v14  ;;  %v2310_v21 = vld [vmem:[%s4074_s2 + $0x40] sm:$0xff]  ;;  %v2311_v22 = vld [vmem:[%s4074_s2 + $0x48] sm:$0xff]  ;;  %v63_v23 = vld [vmem:[%s4075_s1 + $0x18] sm:$0xff] }
   0x7   :  { %3124 = vmatprep.subr.bf16.mxu1 %v3123_v17  ;;  %v64_v24 = vld [vmem:[%s4075_s1 + $0x20] sm:$0xff]  ;;  %v3115_v25 = vpack.c.bf16 %v2311_v22, %v2310_v21  ;;  %v65_v26 = vld [vmem:[%s4075_s1 + $0x28] sm:$0xff]  ;;  %v66_v27 = vld [vmem:[%s4075_s1 + $0x30] sm:$0xff] }
   0x8   :  { %3126 = vmatpush3.bf16.msra.mxu1 %v3123_v17  ;;  %v67_v28 = vld [vmem:[%s4075_s1 + $0x38] sm:$0xff]  ;;  %v2312_v29 = vld [vmem:[%s4074_s2 + $0x50] sm:$0xff]  ;;  %v532_v32 = vld [vmem:[%s4076_s3] sm:$0xff] }
   0x9   :  { %3106 = vmatpush3.bf16.msra.mxu0 %v3103_v6  ;;  %3128 = vmatprep.subr.bf16.mxu1 %v3127_v20  ;;  %v2313_v30 = vld [vmem:[%s4074_s2 + $0x58] sm:$0xff]  ;;  %v533_v33 = vld [vmem:[%s4076_s3 + $0x8] sm:$0xff]  ;;  %v534_v35 = vld [vmem:[%s4076_s3 + $0x10] sm:$0xff] }
   0xa   :  { %3108 = vmatprep.subr.bf16.mxu0 %v3107_v9  ;;  %v3119_v31 = vpack.c.bf16 %v2313_v30, %v2312_v29  ;;  %v3131_v34 = vpack.c.bf16 %v533_v33, %v532_v32  ;;  %v535_v36 = vld [vmem:[%s4076_s3 + $0x18] sm:$0xff]  ;;  %v3526_v38 = vld [vmem:[%s4077_s0 + $0x8] sm:$0xff]  ;;  %v3577_v29 = vld [vmem:[%s4077_s0 + $0x30] sm:$0xff] }
   0xb   :  { %v3135_v37 = vpack.c.bf16 %v535_v36, %v534_v35  ;;  %v3582_v30 = vld [vmem:[%s4077_s0 + $0x48] sm:$0xff]  ;;  %v3594_v32 = vld [vmem:[%s4077_s0 + $0x58] sm:$0xff]  ;;  %v3601_v33 = vld [vmem:[%s4077_s0 + $0x50] sm:$0xff] }
   0xc   :  { %2808 = vmatmul.mubr.msk.f32.vlgmr.msra.gmra.mrb[0].mxu0 %vm72_vm0, %v3435_v16  ;;  %3130 = vmatpush3.bf16.msra.mxu1 %v3127_v20  ;;  %v3613_v35 = vld [vmem:[%s4077_s0 + $0x60] sm:$0xff]  ;;  %v3618_v36 = vld [vmem:[%s4077_s0 + $0x78] sm:$0xff] }
   0xd   :  { %3110 = vmatpush3.bf16.msra.mxu0 %v3107_v9  ;;  %2810 = vmatprep.mubr.msk.f32.mxu0 %vm72_vm0, %v3440_v18 }
   0xe   :  { %3112 = vmatprep.subr.bf16.mxu0 %v3111_v19 }
   0xf   :  { %2868 = vmatmul.mubr.msk.f32.vlgmr.msra.gmra.mrb[0].mxu1 %vm72_vm0, %v3435_v16 }
  0x10   :  { %2811 = vmatmul.mubr.msk.f32.gmra.mrb[2].mxu0 %vm72_vm0, %v63_v23  ;;  %2870 = vmatprep.mubr.msk.f32.mxu1 %vm72_vm0, %v3440_v18 }
  0x11   :  { %2813 = vmatprep.mubr.msk.f32.mxu0 %vm72_vm0, %v64_v24  ;;  %3114 = vmatpush3.bf16.msra.mxu0 %v3111_v19 }
  0x12   :  { %3116 = vmatprep.subr.bf16.mxu0 %v3115_v25 }
  0x13   :  { %2871 = vmatmul.mubr.msk.f32.gmra.mrb[2].mxu1 %vm72_vm0, %v63_v23 }
  0x14   :  { %2814 = vmatmul.mubr.msk.f32.gmra.mrb[4].mxu0 %vm72_vm0, %v65_v26  ;;  %2873 = vmatprep.mubr.msk.f32.mxu1 %vm72_vm0, %v64_v24 }
  0x15   :  { %2816 = vmatprep.mubr.msk.f32.mxu0 %vm72_vm0, %v66_v27 }
  0x17   :  { %2874 = vmatmul.mubr.msk.f32.gmra.mrb[4].mxu1 %vm72_vm0, %v65_v26 }
  0x18   :  { %2817 = vmatmul.mubr.msk.f32.gmra.mrb[6].mxu0 %vm72_vm0, %v67_v28  ;;  %2876 = vmatprep.mubr.msk.f32.mxu1 %vm72_vm0, %v66_v27 }
  0x19   :  { %2827 = vmatprep.mubr.msk.f32.mxu0 %vm72_vm0, %v3402_v5 }
  0x1b   :  { %2877 = vmatmul.mubr.msk.f32.gmra.mrb[6].mxu1 %vm72_vm0, %v67_v28 }
  0x1c   :  { %2828 = vmatmul.mubr.msk.f32.vlgmr.msra.gmra.mrb[8].mxu0 %vm72_vm0, %v3435_v16  ;;  %705 = vmatprep.mubr.f32.mxu1 %v3526_v38 }
  0x1d   :  { %3118 = vmatpush3.bf16.msra.mxu0 %v3115_v25  ;;  %2830 = vmatprep.mubr.msk.f32.mxu0 %vm72_vm0, %v3440_v18  ;;  %v3553_v25 = vld [vmem:[%s4077_s0 + $0x10] sm:$0xff] }
  0x1e   :  { %3120 = vmatprep.subr.bf16.mxu0 %v3119_v31 }
  0x20   :  { %2831 = vmatmul.mubr.msk.f32.gmra.mrb[10].mxu0 %vm72_vm0, %v63_v23 }
  0x21   :  { %2833 = vmatprep.mubr.msk.f32.mxu0 %vm72_vm0, %v64_v24  ;;  %3122 = vmatpush3.bf16.msra.mxu0 %v3119_v31  ;;  %v3589_v31 = vld [vmem:[%s4077_s0 + $0x40] sm:$0xff] }
  0x22   :  { %3132 = vmatprep.subr.bf16.mxu0 %v3131_v34 }
  0x24   :  { %2834 = vmatmul.mubr.msk.f32.gmra.mrb[12].mxu0 %vm72_vm0, %v65_v26 }
  0x25   :  { %2836 = vmatprep.mubr.msk.f32.mxu0 %vm72_vm0, %v66_v27 }
  0x28   :  { %2837 = vmatmul.mubr.msk.f32.gmra.mrb[14].mxu0 %vm72_vm0, %v67_v28 }
  0x29   :  { %2847 = vmatprep.mubr.msk.f32.mxu0 %vm72_vm0, %v3402_v5 }
  0x2c   :  { %2848 = vmatmul.mubr.msk.f32.vlgmr.msra.gmra.mrb[16].mxu0 %vm72_vm0, %v3435_v16 }
  0x2d   :  { %2850 = vmatprep.mubr.msk.f32.mxu0 %vm72_vm0, %v3440_v18  ;;  %3134 = vmatpush3.bf16.msra.mxu0 %v3131_v34  ;;  %v3606_v34 = vld [vmem:[%s4077_s0 + $0x68] sm:$0xff] }
  0x2e   :  { %3136 = vmatprep.subr.bf16.mxu0 %v3135_v37 }
  0x30   :  { %2851 = vmatmul.mubr.msk.f32.gmra.mrb[18].mxu0 %vm72_vm0, %v63_v23 }
  0x31   :  { %2853 = vmatprep.mubr.msk.f32.mxu0 %vm72_vm0, %v64_v24  ;;  %3138 = vmatpush3.bf16.msra.mxu0 %v3135_v37  ;;  %v3625_v37 = vld [vmem:[%s4077_s0 + $0x70] sm:$0xff] }
  0x34   :  { %2854 = vmatmul.mubr.msk.f32.gmra.mrb[20].mxu0 %vm72_vm0, %v65_v26 }
  0x35   :  { %2856 = vmatprep.mubr.msk.f32.mxu0 %vm72_vm0, %v66_v27 }
  0x38   :  { %2857 = vmatmul.mubr.msk.f32.gmra.mrb[22].mxu0 %vm72_vm0, %v67_v28 }
  0x39   :  { %2887 = vmatprep.mubr.msk.f32.mxu0 %vm72_vm0, %v3402_v5 }
  0x3c   :  { %2888 = vmatmul.mubr.msk.f32.vlgmr.msra.gmra.mrb[24].mxu0 %vm72_vm0, %v3435_v16 }
  0x3d   :  { %2890 = vmatprep.mubr.msk.f32.mxu0 %vm72_vm0, %v3440_v18 }
  0x40   :  { %2891 = vmatmul.mubr.msk.f32.gmra.mrb[26].mxu0 %vm72_vm0, %v63_v23  ;;  %v3541_v23 = vld [vmem:[%s4077_s0] sm:$0xff] }
  0x41   :  { %2893 = vmatprep.mubr.msk.f32.mxu0 %vm72_vm0, %v64_v24  ;;  %v3546_v24 = vld [vmem:[%s4077_s0 + $0x18] sm:$0xff] }
  0x44   :  { %2894 = vmatmul.mubr.msk.f32.gmra.mrb[28].mxu0 %vm72_vm0, %v65_v26  ;;  %v3558_v26 = vld [vmem:[%s4077_s0 + $0x28] sm:$0xff] }
  0x45   :  { %2896 = vmatprep.mubr.msk.f32.mxu0 %vm72_vm0, %v66_v27  ;;  %v3565_v27 = vld [vmem:[%s4077_s0 + $0x20] sm:$0xff] }
  0x48   :  { %2897 = vmatmul.mubr.msk.f32.gmra.mrb[30].mxu0 %vm72_vm0, %v67_v28  ;;  %v3570_v28 = vld [vmem:[%s4077_s0 + $0x38] sm:$0xff] }
  0xdf   :  { %v2809_v39 = vpop.f32.mrb[0].mxu0 }
  0xe0   :  { %v163_v40 = vpop.f32.mrb[1].mxu0 }
  0xe1   :  { %v3141_v41 = vpack.c.bf16 %v2809_v39, %v163_v40 }
  0xe2   :  { %v2869_v45 = vpop.f32.mrb[0].mxu1 }
  0xe3   :  { %v2812_v42 = vpop.f32.mrb[2].mxu0  ;;  %v493_v47 = vpop.f32.mrb[1].mxu1 }
  0xe4   :  { %v173_v43 = vpop.f32.mrb[3].mxu0  ;;  %v3155_v49 = vpack.c.bf16 %v2869_v45, %v493_v47  ;;  %v2376_v45 = vld [vmem:[%s4078_s5 + $0x68] sm:$0xff]  ;;  %v771_v47 = vld [vmem:[%s4078_s5 + $0x10] sm:$0xff] }
  0xe5   :  { %v3145_v44 = vpack.c.bf16 %v2812_v42, %v173_v43  ;;  %v770_v42 = vld [vmem:[%s4078_s5 + $0x8] sm:$0xff]  ;;  %v2375_v43 = vld [vmem:[%s4078_s5 + $0x60] sm:$0xff] }
  0xe6   :  { %v2872_v51 = vpop.f32.mrb[2].mxu1 }
  0xe7   :  { %v2815_v46 = vpop.f32.mrb[4].mxu0  ;;  %v503_v53 = vpop.f32.mrb[3].mxu1 }
  0xe8   :  { %v183_v48 = vpop.f32.mrb[5].mxu0  ;;  %v3159_v55 = vpack.c.bf16 %v2872_v51, %v503_v53  ;;  %v2378_v51 = vld [vmem:[%s4078_s5 + $0x78] sm:$0xff] }
  0xe9   :  { %v3149_v50 = vpack.c.bf16 %v2815_v46, %v183_v48  ;;  %v3195_v46 = vpack.c.bf16 %v2376_v45, %v2375_v43  ;;  %v772_v48 = vld [vmem:[%s4078_s5 + $0x18] sm:$0xff] }
  0xea   :  { %v2875_v57 = vpop.f32.mrb[4].mxu1 }
  0xeb   :  { %v2818_v52 = vpop.f32.mrb[6].mxu0  ;;  %v513_v59 = vpop.f32.mrb[5].mxu1 }
  0xec   :  { %v193_v54 = vpop.f32.mrb[7].mxu0  ;;  %v3163_v61 = vpack.c.bf16 %v2875_v57, %v513_v59  ;;  %v2351_v59 = vld [vmem:[%s4078_s5 + $0x20] sm:$0xff] }
  0xed   :  { %v3153_v56 = vpack.c.bf16 %v2818_v52, %v193_v54 }
  0xee   :  { %v2878_v63 = vpop.f32.mrb[6].mxu1 }
  0xef   :  { %v2829_v58 = vpop.f32.mrb[8].mxu0  ;;  %v523_v1 = vpop.f32.mrb[7].mxu1 }
  0xf0   :  { %v273_v60 = vpop.f32.mrb[9].mxu0  ;;  %v3167_v3 = vpack.c.bf16 %v2878_v63, %v523_v1  ;;  %v3665_v1 = vld [vmem:[%s4079_s4] ss:$0 sm:$0xff] }
  0xf1   :  { %v3157_v62 = vpack.c.bf16 %v2829_v58, %v273_v60  ;;  %v2352_v60 = vld [vmem:[%s4078_s5 + $0x28] sm:$0xff] }
  0xf3   :  { %v2832_v0 = vpop.f32.mrb[10].mxu0 }
  0xf4   :  { %v283_v2 = vpop.f32.mrb[11].mxu0 }
  0xf5   :  { %v3161_v4 = vpack.c.bf16 %v2832_v0, %v283_v2 }
  0xf7   :  { %v2835_v5 = vpop.f32.mrb[12].mxu0 }
  0xf8   :  { %v293_v6 = vpop.f32.mrb[13].mxu0 }
  0xf9   :  { %v3165_v7 = vpack.c.bf16 %v2835_v5, %v293_v6 }
  0xfb   :  { %v2838_v8 = vpop.f32.mrb[14].mxu0 }
  0xfc   :  { %v303_v9 = vpop.f32.mrb[15].mxu0 }
  0xfd   :  { %v3169_v10 = vpack.c.bf16 %v2838_v8, %v303_v9 }
  0xff   :  { %v2849_v11 = vpop.f32.mrb[16].mxu0 }
 0x100   :  { %v383_v12 = vpop.f32.mrb[17].mxu0 }
 0x101   :  { %v3139_v13 = vpack.c.bf16 %v2849_v11, %v383_v12  ;;  %v2353_v11 = vld [vmem:[%s4078_s5 + $0x30] sm:$0xff]  ;;  %v2354_v12 = vld [vmem:[%s4078_s5 + $0x38] sm:$0xff] }
 0x103   :  { %v2852_v14 = vpop.f32.mrb[18].mxu0  ;;  %3140 = vmatprep.subr.bf16.mxu1 %v3139_v13 }
 0x104   :  { %v393_v15 = vpop.f32.mrb[19].mxu0  ;;  %3142 = vmatpush3.bf16.msra.mxu1 %v3141_v41  ;;  %v769_v41 = vld [vmem:[%s4078_s5] sm:$0xff] }
 0x105   :  { %v3143_v16 = vpack.c.bf16 %v2852_v14, %v393_v15 }
 0x107   :  { %v2855_v17 = vpop.f32.mrb[20].mxu0  ;;  %3144 = vmatprep.subr.bf16.mxu1 %v3143_v16 }
 0x108   :  { %v403_v18 = vpop.f32.mrb[21].mxu0  ;;  %3146 = vmatpush3.bf16.msra.mxu1 %v3145_v44  ;;  %v3171_v44 = vpack.c.bf16 %v770_v42, %v769_v41 }
 0x109   :  { %v3147_v19 = vpack.c.bf16 %v2855_v17, %v403_v18  ;;  %v3183_v18 = vpack.c.bf16 %v2354_v12, %v2353_v11  ;;  %v1234_v12 = vld [vmem:[%s4080_s6 + $0x10] sm:$0xff] }
 0x10a   :  { %3172 = vmatprep.subr.bf16.mxu0 %v3171_v44 }
 0x10b   :  { %v2858_v20 = vpop.f32.mrb[22].mxu0  ;;  %3148 = vmatprep.subr.bf16.mxu1 %v3147_v19  ;;  %3174 = vmatpush3.bf16.msra.mxu0 %v3171_v44 }
 0x10c   :  { %v413_v21 = vpop.f32.mrb[23].mxu0  ;;  %3150 = vmatpush3.bf16.msra.mxu1 %v3149_v50  ;;  %v3175_v50 = vpack.c.bf16 %v772_v48, %v771_v47 }
 0x10d   :  { %v3151_v22 = vpack.c.bf16 %v2858_v20, %v413_v21  ;;  %v2363_v20 = vld [vmem:[%s4078_s5 + $0x40] sm:$0xff]  ;;  %v2364_v21 = vld [vmem:[%s4078_s5 + $0x48] sm:$0xff] }
 0x10e   :  { %3176 = vmatprep.subr.bf16.mxu0 %v3175_v50  ;;  %v3187_v43 = vpack.c.bf16 %v2364_v21, %v2363_v20 }
 0x10f   :  { %3152 = vmatprep.subr.bf16.mxu1 %v3151_v22  ;;  %v2889_v39 = vpop.f32.mrb[24].mxu0  ;;  %3178 = vmatpush3.bf16.msra.mxu0 %v3175_v50 }
 0x110   :  { %3154 = vmatpush3.bf16.msra.mxu1 %v3153_v56  ;;  %v602_v40 = vpop.f32.mrb[25].mxu0 }
 0x111   :  { %3156 = vmatprep.subr.bf16.mxu1 %v3155_v49  ;;  %v2377_v49 = vld [vmem:[%s4078_s5 + $0x70] sm:$0xff] }
 0x112   :  { %v3199_v52 = vpack.c.bf16 %v2378_v51, %v2377_v49 }
 0x113   :  { %v2892_v53 = vpop.f32.mrb[26].mxu0 }
 0x114   :  { %3158 = vmatpush3.bf16.msra.mxu1 %v3157_v62  ;;  %v612_v54 = vpop.f32.mrb[27].mxu0 }
 0x115   :  { %3160 = vmatprep.subr.bf16.mxu1 %v3159_v55 }
 0x117   :  { %v2895_v55 = vpop.f32.mrb[28].mxu0 }
 0x118   :  { %3162 = vmatpush3.bf16.msra.mxu1 %v3161_v4  ;;  %v622_v56 = vpop.f32.mrb[29].mxu0 }
 0x119   :  { %3164 = vmatprep.subr.bf16.mxu1 %v3163_v61  ;;  %v3179_v61 = vpack.c.bf16 %v2352_v60, %v2351_v59 }
 0x11b   :  { %v3652_v57 = vpop.f32.mrb[30].mxu0  ;;  %3180 = vmatprep.subr.bf16.mxu0 %v3179_v61 }
 0x11c   :  { %3166 = vmatpush3.bf16.msra.mxu1 %v3165_v7  ;;  %v3654_v58 = vpop.f32.mrb[31].mxu0 }
 0x11d   :  { %3168 = vmatprep.subr.bf16.mxu1 %v3167_v3 }
 0x120   :  { %3170 = vmatpush3.bf16.msra.mxu1 %v3169_v10 }
 0x121   :  { %3196 = vmatprep.subr.bf16.mxu1 %v3195_v46 }
 0x123   :  { %706 = vmatmul.mubr.f32.vlgmr.msra.gmra.mrb[8].mxu1 %v3541_v23 }
 0x124   :  { %710 = vmatprep.mubr.f32.mxu1 %v3546_v24  ;;  %3198 = vmatpush3.bf16.msra.mxu1 %v3195_v46 }
 0x125   :  { %3200 = vmatprep.subr.bf16.mxu1 %v3199_v52 }
 0x127   :  { %711 = vmatmul.mubr.f32.gmra.mrb[10].mxu1 %v3553_v25 }
 0x128   :  { %715 = vmatprep.mubr.f32.mxu1 %v3558_v26  ;;  %3202 = vmatpush3.bf16.msra.mxu1 %v3199_v52 }
 0x12b   :  { %716 = vmatmul.mubr.f32.gmra.mrb[12].mxu1 %v3565_v27 }
 0x12c   :  { %720 = vmatprep.mubr.f32.mxu1 %v3570_v28 }
 0x12f   :  { %721 = vmatmul.mubr.f32.gmra.mrb[14].mxu1 %v3577_v29 }
 0x130   :  { %725 = vmatprep.mubr.f32.mxu1 %v3582_v30 }
 0x133   :  { %726 = vmatmul.mubr.f32.gmra.mrb[16].mxu1 %v3589_v31 }
 0x134   :  { %730 = vmatprep.mubr.f32.mxu1 %v3594_v32 }
 0x137   :  { %731 = vmatmul.mubr.f32.gmra.mrb[18].mxu1 %v3601_v33 }
 0x138   :  { %735 = vmatprep.mubr.f32.mxu1 %v3606_v34 }
 0x13b   :  { %736 = vmatmul.mubr.f32.gmra.mrb[20].mxu1 %v3613_v35 }
 0x13c   :  { %740 = vmatprep.mubr.f32.mxu1 %v3618_v36 }
 0x13f   :  { %741 = vmatmul.mubr.f32.gmra.mrb[22].mxu1 %v3625_v37 }
 0x1f6   :  { %v2543_v62 = vpop.f32.mrb[8].mxu1 }
 0x1f7   :  { %v2544_v63 = vpop.f32.mrb[9].mxu1 }
 0x1f8   :  { %v2545_v0 = vadd.f32 %v2544_v63, %v2543_v62 }
 0x1fa   :  { %v708_v2 = vadd.f32 %v2545_v0, %v602_v40  ;;  %v2546_v3 = vpop.f32.mrb[10].mxu1 }
 0x1fb   :  { %v2547_v4 = vpop.f32.mrb[11].mxu1 }
 0x1fc   :  { %v753_v5 = vadd.f32 %v3665_v1, %v708_v2  ;;  %v2548_v6 = vadd.f32 %v2547_v4, %v2546_v3 }
 0x1fe   :  { %v3668_v7 = vmax.f32 %v753_v5, 0.0  ;;  %v713_v8 = vadd.f32 %v2889_v39, %v2548_v6  ;;  %v2549_v9 = vpop.f32.mrb[12].mxu1 }
 0x1ff   :  { %v2550_v10 = vpop.f32.mrb[13].mxu1 }
 0x200   :  { %v754_v13 = vadd.f32 %v3665_v1, %v713_v8  ;;  %v2551_v14 = vadd.f32 %v2550_v10, %v2549_v9  ;;  %2907 = vmatprep.mubr.msk.f32.mxu0 %vm72_vm0, %v3668_v7  ;;  %2967 = vmatprep.mubr.msk.f32.mxu1 %vm72_vm0, %v3668_v7  ;;  %v2366_v9 = vld [vmem:[%s4078_s5 + $0x58] sm:$0xff]  ;;  %v1233_v10 = vld [vmem:[%s4080_s6 + $0x8] sm:$0xff] }
 0x202   :  { %v3681_v15 = vmax.f32 %v754_v13, 0.0  ;;  %v718_v16 = vadd.f32 %v2551_v14, %v612_v54  ;;  %v2552_v17 = vpop.f32.mrb[14].mxu1  ;;  %v1235_v13 = vld [vmem:[%s4080_s6 + $0x18] sm:$0xff] }
 0x203   :  { %v2553_v19 = vpop.f32.mrb[15].mxu1  ;;  %v3207_v14 = vpack.c.bf16 %v1235_v13, %v1234_v12 }
 0x204   :  { %v755_v22 = vadd.f32 %v3665_v1, %v718_v16  ;;  %v2554_v39 = vadd.f32 %v2553_v19, %v2552_v17  ;;  %2908 = vmatmul.mubr.msk.f32.vlgmr.msra.gmra.mrb[32].mxu0 %vm72_vm0, %v3681_v15  ;;  %2968 = vmatmul.mubr.msk.f32.vlgmr.msra.gmra.mrb[24].mxu1 %vm72_vm0, %v3681_v15 }
 0x205   :  { %3182 = vmatpush3.bf16.msra.mxu0 %v3179_v61 }
 0x206   :  { %v3694_v40 = vmax.f32 %v755_v22, 0.0  ;;  %v723_v41 = vadd.f32 %v2892_v53, %v2554_v39  ;;  %v2555_v42 = vpop.f32.mrb[16].mxu1  ;;  %3184 = vmatprep.subr.bf16.mxu0 %v3183_v18 }
 0x207   :  { %v2556_v44 = vpop.f32.mrb[17].mxu1 }
 0x208   :  { %v756_v45 = vadd.f32 %v3665_v1, %v723_v41  ;;  %v2557_v46 = vadd.f32 %v2556_v44, %v2555_v42  ;;  %2910 = vmatprep.mubr.msk.f32.mxu0 %vm72_vm0, %v3694_v40  ;;  %2970 = vmatprep.mubr.msk.f32.mxu1 %vm72_vm0, %v3694_v40 }
 0x209   :  { %3186 = vmatpush3.bf16.msra.mxu0 %v3183_v18 }
 0x20a   :  { %v3701_v47 = vmax.f32 %v756_v45, 0.0  ;;  %v728_v48 = vadd.f32 %v2557_v46, %v622_v56  ;;  %v2558_v49 = vpop.f32.mrb[18].mxu1  ;;  %3188 = vmatprep.subr.bf16.mxu0 %v3187_v43 }
 0x20b   :  { %v2559_v50 = vpop.f32.mrb[19].mxu1 }
 0x20c   :  { %v757_v51 = vadd.f32 %v3665_v1, %v728_v48  ;;  %v2560_v52 = vadd.f32 %v2559_v50, %v2558_v49  ;;  %2911 = vmatmul.mubr.msk.f32.gmra.mrb[34].mxu0 %vm72_vm0, %v3701_v47  ;;  %2971 = vmatmul.mubr.msk.f32.gmra.mrb[26].mxu1 %vm72_vm0, %v3701_v47 }
 0x20e   :  { %v765_v53 = vmax.f32 %v757_v51, 0.0  ;;  %v733_v54 = vadd.f32 %v2895_v55, %v2560_v52  ;;  %v2561_v59 = vpop.f32.mrb[20].mxu1 }
 0x20f   :  { %v2562_v60 = vpop.f32.mrb[21].mxu1 }
 0x210   :  { %v758_v61 = vadd.f32 %v3665_v1, %v733_v54  ;;  %v2563_v62 = vadd.f32 %v2562_v60, %v2561_v59  ;;  %2913 = vmatprep.mubr.msk.f32.mxu0 %vm72_vm0, %v765_v53  ;;  %2973 = vmatprep.mubr.msk.f32.mxu1 %vm72_vm0, %v765_v53 }
 0x212   :  { %v766_v56 = vmax.f32 %v758_v61, 0.0  ;;  %v738_v63 = vadd.f32 %v2563_v62, %v3654_v58  ;;  %v2564_v0 = vpop.f32.mrb[22].mxu1  ;;  %v2365_v58 = vld [vmem:[%s4078_s5 + $0x50] sm:$0xff] }
 0x213   :  { %v2565_v2 = vpop.f32.mrb[23].mxu1 }
 0x214   :  { %v759_v3 = vadd.f32 %v3665_v1, %v738_v63  ;;  %v2566_v4 = vadd.f32 %v2565_v2, %v2564_v0  ;;  %2914 = vmatmul.mubr.msk.f32.gmra.mrb[36].mxu0 %vm72_vm0, %v766_v56  ;;  %2974 = vmatmul.mubr.msk.f32.gmra.mrb[28].mxu1 %vm72_vm0, %v766_v56 }
 0x216   :  { %v767_v55 = vmax.f32 %v759_v3, 0.0  ;;  %v743_v5 = vadd.f32 %v3652_v57, %v2566_v4  ;;  %v3191_v57 = vpack.c.bf16 %v2366_v9, %v2365_v58 }
 0x218   :  { %v760_v6 = vadd.f32 %v3665_v1, %v743_v5  ;;  %2916 = vmatprep.mubr.msk.f32.mxu0 %vm72_vm0, %v767_v55  ;;  %2976 = vmatprep.mubr.msk.f32.mxu1 %vm72_vm0, %v767_v55  ;;  %v1232_v1 = vld [vmem:[%s4080_s6] sm:$0xff] }
 0x219   :  { %v3203_v11 = vpack.c.bf16 %v1233_v10, %v1232_v1 }
 0x21a   :  { %v768_v8 = vmax.f32 %v760_v6, 0.0 }
 0x21c   :  { %2917 = vmatmul.mubr.msk.f32.gmra.mrb[38].mxu0 %vm72_vm0, %v768_v8  ;;  %2977 = vmatmul.mubr.msk.f32.gmra.mrb[30].mxu1 %vm72_vm0, %v768_v8 }
 0x21d   :  { %2927 = vmatprep.mubr.msk.f32.mxu0 %vm72_vm0, %v3668_v7  ;;  %1405 = vmatprep.mubr.f32.mxu1 %v3526_v38 }
 0x220   :  { %2928 = vmatmul.mubr.msk.f32.vlgmr.msra.gmra.mrb[40].mxu0 %vm72_vm0, %v3681_v15 }
 0x221   :  { %2930 = vmatprep.mubr.msk.f32.mxu0 %vm72_vm0, %v3694_v40  ;;  %3190 = vmatpush3.bf16.msra.mxu0 %v3187_v43 }
 0x222   :  { %3192 = vmatprep.subr.bf16.mxu0 %v3191_v57 }
 0x224   :  { %2931 = vmatmul.mubr.msk.f32.gmra.mrb[42].mxu0 %vm72_vm0, %v3701_v47 }
 0x225   :  { %2933 = vmatprep.mubr.msk.f32.mxu0 %vm72_vm0, %v765_v53  ;;  %3194 = vmatpush3.bf16.msra.mxu0 %v3191_v57 }
 0x226   :  { %3204 = vmatprep.subr.bf16.mxu0 %v3203_v11 }
 0x228   :  { %2934 = vmatmul.mubr.msk.f32.gmra.mrb[44].mxu0 %vm72_vm0, %v766_v56 }
 0x229   :  { %2936 = vmatprep.mubr.msk.f32.mxu0 %vm72_vm0, %v767_v55 }
 0x22c   :  { %2937 = vmatmul.mubr.msk.f32.gmra.mrb[46].mxu0 %vm72_vm0, %v768_v8 }
 0x22d   :  { %2947 = vmatprep.mubr.msk.f32.mxu0 %vm72_vm0, %v3668_v7 }
 0x230   :  { %2948 = vmatmul.mubr.msk.f32.vlgmr.msra.gmra.mrb[48].mxu0 %vm72_vm0, %v3681_v15 }
 0x231   :  { %2950 = vmatprep.mubr.msk.f32.mxu0 %vm72_vm0, %v3694_v40  ;;  %3206 = vmatpush3.bf16.msra.mxu0 %v3203_v11 }
 0x232   :  { %3208 = vmatprep.subr.bf16.mxu0 %v3207_v14 }
 0x234   :  { %2951 = vmatmul.mubr.msk.f32.gmra.mrb[50].mxu0 %vm72_vm0, %v3701_v47 }
 0x235   :  { %2953 = vmatprep.mubr.msk.f32.mxu0 %vm72_vm0, %v765_v53  ;;  %3210 = vmatpush3.bf16.msra.mxu0 %v3207_v14 }
 0x238   :  { %2954 = vmatmul.mubr.msk.f32.gmra.mrb[52].mxu0 %vm72_vm0, %v766_v56 }
 0x239   :  { %2956 = vmatprep.mubr.msk.f32.mxu0 %vm72_vm0, %v767_v55 }
 0x23c   :  { %2957 = vmatmul.mubr.msk.f32.gmra.mrb[54].mxu0 %vm72_vm0, %v768_v8 }
 0x23d   :  { %2987 = vmatprep.mubr.msk.f32.mxu0 %vm72_vm0, %v3668_v7 }
 0x240   :  { %2988 = vmatmul.mubr.msk.f32.vlgmr.msra.gmra.mrb[56].mxu0 %vm72_vm0, %v3681_v15 }
 0x241   :  { %2990 = vmatprep.mubr.msk.f32.mxu0 %vm72_vm0, %v3694_v40 }
 0x244   :  { %2991 = vmatmul.mubr.msk.f32.gmra.mrb[58].mxu0 %vm72_vm0, %v3701_v47 }
 0x245   :  { %2993 = vmatprep.mubr.msk.f32.mxu0 %vm72_vm0, %v765_v53 }
 0x248   :  { %2994 = vmatmul.mubr.msk.f32.gmra.mrb[60].mxu0 %vm72_vm0, %v766_v56 }
 0x249   :  { %2996 = vmatprep.mubr.msk.f32.mxu0 %vm72_vm0, %v767_v55 }
 0x24c   :  { %2997 = vmatmul.mubr.msk.f32.gmra.mrb[62].mxu0 %vm72_vm0, %v768_v8 }
 0x2d7   :  { %v2909_v16 = vpop.f32.mrb[32].mxu0  ;;  %v2969_v17 = vpop.f32.mrb[24].mxu1 }
 0x2d8   :  { %v863_v7 = vpop.f32.mrb[33].mxu0  ;;  %v1193_v18 = vpop.f32.mrb[25].mxu1 }
 0x2d9   :  { %v3213_v19 = vpack.c.bf16 %v2909_v16, %v863_v7  ;;  %v3227_v15 = vpack.c.bf16 %v2969_v17, %v1193_v18 }
 0x2df   :  { %v2912_v20 = vpop.f32.mrb[34].mxu0  ;;  %v2972_v21 = vpop.f32.mrb[26].mxu1 }
 0x2e0   :  { %v873_v22 = vpop.f32.mrb[35].mxu0  ;;  %v1203_v39 = vpop.f32.mrb[27].mxu1 }
 0x2e1   :  { %v3217_v40 = vpack.c.bf16 %v2912_v20, %v873_v22  ;;  %v3231_v41 = vpack.c.bf16 %v2972_v21, %v1203_v39  ;;  %v1470_v39 = vld [vmem:[%s4081_s8 + $0x8] sm:$0xff] }
 0x2e7   :  { %v2915_v42 = vpop.f32.mrb[36].mxu0  ;;  %v2975_v43 = vpop.f32.mrb[28].mxu1 }
 0x2e8   :  { %v883_v44 = vpop.f32.mrb[37].mxu0  ;;  %v1213_v45 = vpop.f32.mrb[29].mxu1 }
 0x2e9   :  { %v3221_v46 = vpack.c.bf16 %v2915_v42, %v883_v44  ;;  %v3235_v47 = vpack.c.bf16 %v2975_v43, %v1213_v45  ;;  %v2429_v42 = vld [vmem:[%s4081_s8 + $0x68] sm:$0xff]  ;;  %v1471_v44 = vld [vmem:[%s4081_s8 + $0x10] sm:$0xff]  ;;  %v1472_v45 = vld [vmem:[%s4081_s8 + $0x18] sm:$0xff] }
 0x2ef   :  { %v2918_v48 = vpop.f32.mrb[38].mxu0  ;;  %v2978_v49 = vpop.f32.mrb[30].mxu1 }
 0x2f0   :  { %v893_v50 = vpop.f32.mrb[39].mxu0  ;;  %v1223_v51 = vpop.f32.mrb[31].mxu1 }
 0x2f1   :  { %v3225_v52 = vpack.c.bf16 %v2918_v48, %v893_v50  ;;  %v3239_v53 = vpack.c.bf16 %v2978_v49, %v1223_v51  ;;  %v2431_v48 = vld [vmem:[%s4081_s8 + $0x78] sm:$0xff]  ;;  %v2404_v50 = vld [vmem:[%s4081_s8 + $0x20] sm:$0xff]  ;;  %v2405_v51 = vld [vmem:[%s4081_s8 + $0x28] sm:$0xff] }
 0x2f3   :  { %v2929_v54 = vpop.f32.mrb[40].mxu0 }
 0x2f4   :  { %v973_v59 = vpop.f32.mrb[41].mxu0 }
 0x2f5   :  { %v3229_v60 = vpack.c.bf16 %v2929_v54, %v973_v59 }
 0x2f7   :  { %v2932_v61 = vpop.f32.mrb[42].mxu0 }
 0x2f8   :  { %v983_v62 = vpop.f32.mrb[43].mxu0 }
 0x2f9   :  { %v3233_v56 = vpack.c.bf16 %v2932_v61, %v983_v62 }
 0x2fb   :  { %v2935_v63 = vpop.f32.mrb[44].mxu0 }
 0x2fc   :  { %v993_v0 = vpop.f32.mrb[45].mxu0 }
 0x2fd   :  { %v3237_v2 = vpack.c.bf16 %v2935_v63, %v993_v0 }
 0x2ff   :  { %v2938_v3 = vpop.f32.mrb[46].mxu0 }
 0x300   :  { %v1003_v4 = vpop.f32.mrb[47].mxu0 }
 0x301   :  { %v3241_v55 = vpack.c.bf16 %v2938_v3, %v1003_v4 }
 0x303   :  { %v2949_v5 = vpop.f32.mrb[48].mxu0 }
 0x304   :  { %v1083_v6 = vpop.f32.mrb[49].mxu0 }
 0x305   :  { %v3211_v8 = vpack.c.bf16 %v2949_v5, %v1083_v6  ;;  %v2406_v5 = vld [vmem:[%s4081_s8 + $0x30] sm:$0xff]  ;;  %v2407_v6 = vld [vmem:[%s4081_s8 + $0x38] sm:$0xff] }
 0x307   :  { %v2952_v58 = vpop.f32.mrb[50].mxu0  ;;  %3212 = vmatprep.subr.bf16.mxu1 %v3211_v8 }
 0x308   :  { %v1093_v9 = vpop.f32.mrb[51].mxu0  ;;  %3214 = vmatpush3.bf16.msra.mxu1 %v3213_v19 }
 0x309   :  { %v3215_v57 = vpack.c.bf16 %v2952_v58, %v1093_v9 }
 0x30b   :  { %v2955_v1 = vpop.f32.mrb[52].mxu0  ;;  %3216 = vmatprep.subr.bf16.mxu1 %v3215_v57 }
 0x30c   :  { %v1103_v10 = vpop.f32.mrb[53].mxu0  ;;  %3218 = vmatpush3.bf16.msra.mxu1 %v3217_v40  ;;  %v2428_v40 = vld [vmem:[%s4081_s8 + $0x60] sm:$0xff] }
 0x30d   :  { %v3219_v11 = vpack.c.bf16 %v2955_v1, %v1103_v10  ;;  %v3267_v43 = vpack.c.bf16 %v2429_v42, %v2428_v40  ;;  %v3255_v10 = vpack.c.bf16 %v2407_v6, %v2406_v5  ;;  %v1935_v6 = vld [vmem:[%s4083_s9 + $0x18] sm:$0xff] }
 0x30f   :  { %v2958_v12 = vpop.f32.mrb[54].mxu0  ;;  %3220 = vmatprep.subr.bf16.mxu1 %v3219_v11 }
 0x310   :  { %v1113_v13 = vpop.f32.mrb[55].mxu0  ;;  %3222 = vmatpush3.bf16.msra.mxu1 %v3221_v46  ;;  %v2430_v46 = vld [vmem:[%s4081_s8 + $0x70] sm:$0xff] }
 0x311   :  { %v3223_v14 = vpack.c.bf16 %v2958_v12, %v1113_v13  ;;  %v3271_v49 = vpack.c.bf16 %v2431_v48, %v2430_v46  ;;  %v2416_v12 = vld [vmem:[%s4081_s8 + $0x40] sm:$0xff]  ;;  %v2417_v13 = vld [vmem:[%s4081_s8 + $0x48] sm:$0xff] }
 0x313   :  { %v3776_v16 = vpop.f32.mrb[56].mxu0  ;;  %3224 = vmatprep.subr.bf16.mxu1 %v3223_v14 }
 0x314   :  { %v1302_v17 = vpop.f32.mrb[57].mxu0  ;;  %3226 = vmatpush3.bf16.msra.mxu1 %v3225_v52  ;;  %v3251_v52 = vpack.c.bf16 %v2405_v51, %v2404_v50 }
 0x315   :  { %3228 = vmatprep.subr.bf16.mxu1 %v3227_v15  ;;  %v1469_v15 = vld [vmem:[%s4081_s8] sm:$0xff] }
 0x317   :  { %v3778_v7 = vpop.f32.mrb[58].mxu0 }
 0x318   :  { %v3780_v18 = vpop.f32.mrb[59].mxu0  ;;  %3230 = vmatpush3.bf16.msra.mxu1 %v3229_v60  ;;  %v3838_v60 = vld [vmem:[%s4082_s7] ss:$0 sm:$0xff] }
 0x319   :  { %3232 = vmatprep.subr.bf16.mxu1 %v3231_v41  ;;  %v3243_v41 = vpack.c.bf16 %v1470_v39, %v1469_v15  ;;  %v3259_v39 = vpack.c.bf16 %v2417_v13, %v2416_v12 }
 0x31b   :  { %v3782_v19 = vpop.f32.mrb[60].mxu0  ;;  %3244 = vmatprep.subr.bf16.mxu0 %v3243_v41 }
 0x31c   :  { %v3784_v20 = vpop.f32.mrb[61].mxu0  ;;  %3234 = vmatpush3.bf16.msra.mxu1 %v3233_v56  ;;  %3246 = vmatpush3.bf16.msra.mxu0 %v3243_v41 }
 0x31d   :  { %3236 = vmatprep.subr.bf16.mxu1 %v3235_v47  ;;  %v3247_v47 = vpack.c.bf16 %v1472_v45, %v1471_v44 }
 0x31f   :  { %v3786_v21 = vpop.f32.mrb[62].mxu0  ;;  %3248 = vmatprep.subr.bf16.mxu0 %v3247_v47 }
 0x320   :  { %v3788_v22 = vpop.f32.mrb[63].mxu0  ;;  %3238 = vmatpush3.bf16.msra.mxu1 %v3237_v2  ;;  %3250 = vmatpush3.bf16.msra.mxu0 %v3247_v47 }
 0x321   :  { %3240 = vmatprep.subr.bf16.mxu1 %v3239_v53  ;;  %3252 = vmatprep.subr.bf16.mxu0 %v3251_v52 }
 0x324   :  { %3242 = vmatpush3.bf16.msra.mxu1 %v3241_v55 }
 0x325   :  { %3268 = vmatprep.subr.bf16.mxu1 %v3267_v43 }
 0x327   :  { %1406 = vmatmul.mubr.f32.vlgmr.msra.gmra.mrb[32].mxu1 %v3541_v23 }
 0x328   :  { %1410 = vmatprep.mubr.f32.mxu1 %v3546_v24  ;;  %3270 = vmatpush3.bf16.msra.mxu1 %v3267_v43 }
 0x329   :  { %3272 = vmatprep.subr.bf16.mxu1 %v3271_v49 }
 0x32b   :  { %1411 = vmatmul.mubr.f32.gmra.mrb[34].mxu1 %v3553_v25 }
 0x32c   :  { %1415 = vmatprep.mubr.f32.mxu1 %v3558_v26  ;;  %3274 = vmatpush3.bf16.msra.mxu1 %v3271_v49 }
 0x32f   :  { %1416 = vmatmul.mubr.f32.gmra.mrb[36].mxu1 %v3565_v27 }
 0x330   :  { %1420 = vmatprep.mubr.f32.mxu1 %v3570_v28 }
 0x333   :  { %1421 = vmatmul.mubr.f32.gmra.mrb[38].mxu1 %v3577_v29 }
 0x334   :  { %1425 = vmatprep.mubr.f32.mxu1 %v3582_v30 }
 0x337   :  { %1426 = vmatmul.mubr.f32.gmra.mrb[40].mxu1 %v3589_v31 }
 0x338   :  { %1430 = vmatprep.mubr.f32.mxu1 %v3594_v32 }
 0x33b   :  { %1431 = vmatmul.mubr.f32.gmra.mrb[42].mxu1 %v3601_v33 }
 0x33c   :  { %1435 = vmatprep.mubr.f32.mxu1 %v3606_v34 }
 0x33f   :  { %1436 = vmatmul.mubr.f32.gmra.mrb[44].mxu1 %v3613_v35 }
 0x340   :  { %1440 = vmatprep.mubr.f32.mxu1 %v3618_v36 }
 0x343   :  { %1441 = vmatmul.mubr.f32.gmra.mrb[46].mxu1 %v3625_v37 }
 0x3fa   :  { %v2659_v53 = vpop.f32.mrb[32].mxu1 }
 0x3fb   :  { %v2660_v54 = vpop.f32.mrb[33].mxu1 }
 0x3fc   :  { %v2661_v59 = vadd.f32 %v2660_v54, %v2659_v53 }
 0x3fe   :  { %v1408_v61 = vadd.f32 %v2661_v59, %v1302_v17  ;;  %v2662_v62 = vpop.f32.mrb[34].mxu1 }
 0x3ff   :  { %v2663_v56 = vpop.f32.mrb[35].mxu1 }
 0x400   :  { %v1453_v63 = vadd.f32 %v3838_v60, %v1408_v61  ;;  %v2664_v0 = vadd.f32 %v2663_v56, %v2662_v62 }
 0x402   :  { %v3841_v2 = vmax.f32 %v1453_v63, 0.0  ;;  %v1413_v3 = vadd.f32 %v3776_v16, %v2664_v0  ;;  %v2665_v4 = vpop.f32.mrb[36].mxu1 }
 0x403   :  { %v2666_v55 = vpop.f32.mrb[37].mxu1 }
 0x404   :  { %v1454_v8 = vadd.f32 %v3838_v60, %v1413_v3  ;;  %v2667_v58 = vadd.f32 %v2666_v55, %v2665_v4  ;;  %3007 = vmatprep.mubr.msk.f32.mxu0 %vm72_vm0, %v3841_v2  ;;  %3067 = vmatprep.mubr.msk.f32.mxu1 %vm72_vm0, %v3841_v2  ;;  %v2418_v3 = vld [vmem:[%s4081_s8 + $0x50] sm:$0xff]  ;;  %v2419_v4 = vld [vmem:[%s4081_s8 + $0x58] sm:$0xff]  ;;  %v1933_v55 = vld [vmem:[%s4083_s9 + $0x8] sm:$0xff] }
 0x406   :  { %v3855_v9 = vmax.f32 %v1454_v8, 0.0  ;;  %v1418_v57 = vadd.f32 %v2667_v58, %v3780_v18  ;;  %v2668_v1 = vpop.f32.mrb[38].mxu1 }
 0x407   :  { %v2669_v11 = vpop.f32.mrb[39].mxu1 }
 0x408   :  { %v1455_v14 = vadd.f32 %v3838_v60, %v1418_v57  ;;  %v2670_v16 = vadd.f32 %v2669_v11, %v2668_v1  ;;  %3008 = vmatmul.mubr.msk.f32.vlgmr.msra.gmra.mrb[64].mxu0 %vm72_vm0, %v3855_v9  ;;  %3068 = vmatmul.mubr.msk.f32.vlgmr.msra.gmra.mrb[48].mxu1 %vm72_vm0, %v3855_v9 }
 0x409   :  { %3254 = vmatpush3.bf16.msra.mxu0 %v3251_v52 }
 0x40a   :  { %v3869_v17 = vmax.f32 %v1455_v14, 0.0  ;;  %v1423_v18 = vadd.f32 %v3778_v7, %v2670_v16  ;;  %v2671_v15 = vpop.f32.mrb[40].mxu1  ;;  %3256 = vmatprep.subr.bf16.mxu0 %v3255_v10 }
 0x40b   :  { %v2672_v40 = vpop.f32.mrb[41].mxu1 }
 0x40c   :  { %v1456_v41 = vadd.f32 %v3838_v60, %v1423_v18  ;;  %v2673_v42 = vadd.f32 %v2672_v40, %v2671_v15  ;;  %3010 = vmatprep.mubr.msk.f32.mxu0 %vm72_vm0, %v3869_v17  ;;  %3070 = vmatprep.mubr.msk.f32.mxu1 %vm72_vm0, %v3869_v17 }
 0x40d   :  { %3258 = vmatpush3.bf16.msra.mxu0 %v3255_v10 }
 0x40e   :  { %v3877_v43 = vmax.f32 %v1456_v41, 0.0  ;;  %v1428_v44 = vadd.f32 %v2673_v42, %v3784_v20  ;;  %v2674_v45 = vpop.f32.mrb[42].mxu1  ;;  %3260 = vmatprep.subr.bf16.mxu0 %v3259_v39 }
 0x40f   :  { %v2675_v7 = vpop.f32.mrb[43].mxu1 }
 0x410   :  { %v1457_v46 = vadd.f32 %v3838_v60, %v1428_v44  ;;  %v2676_v47 = vadd.f32 %v2675_v7, %v2674_v45  ;;  %3011 = vmatmul.mubr.msk.f32.gmra.mrb[66].mxu0 %vm72_vm0, %v3877_v43  ;;  %3071 = vmatmul.mubr.msk.f32.gmra.mrb[50].mxu1 %vm72_vm0, %v3877_v43 }
 0x412   :  { %v3885_v48 = vmax.f32 %v1457_v46, 0.0  ;;  %v1433_v49 = vadd.f32 %v3782_v19, %v2676_v47  ;;  %v2677_v50 = vpop.f32.mrb[44].mxu1 }
 0x413   :  { %v2678_v51 = vpop.f32.mrb[45].mxu1 }
 0x414   :  { %v1458_v20 = vadd.f32 %v3838_v60, %v1433_v49  ;;  %v2679_v52 = vadd.f32 %v2678_v51, %v2677_v50  ;;  %3013 = vmatprep.mubr.msk.f32.mxu0 %vm72_vm0, %v3885_v48  ;;  %3073 = vmatprep.mubr.msk.f32.mxu1 %vm72_vm0, %v3885_v48 }
 0x416   :  { %v3893_v53 = vmax.f32 %v1458_v20, 0.0  ;;  %v1438_v54 = vadd.f32 %v2679_v52, %v3788_v22  ;;  %v2680_v59 = vpop.f32.mrb[46].mxu1 }
 0x417   :  { %v2681_v61 = vpop.f32.mrb[47].mxu1 }
 0x418   :  { %v1459_v62 = vadd.f32 %v3838_v60, %v1438_v54  ;;  %v2682_v19 = vadd.f32 %v2681_v61, %v2680_v59  ;;  %3014 = vmatmul.mubr.msk.f32.gmra.mrb[68].mxu0 %vm72_vm0, %v3893_v53  ;;  %3074 = vmatmul.mubr.msk.f32.gmra.mrb[52].mxu1 %vm72_vm0, %v3893_v53 }
 0x41a   :  { %v3901_v56 = vmax.f32 %v1459_v62, 0.0  ;;  %v1443_v63 = vadd.f32 %v3786_v21, %v2682_v19  ;;  %v3263_v21 = vpack.c.bf16 %v2419_v4, %v2418_v3 }
 0x41c   :  { %v1460_v0 = vadd.f32 %v3838_v60, %v1443_v63  ;;  %3016 = vmatprep.mubr.msk.f32.mxu0 %vm72_vm0, %v3901_v56  ;;  %3076 = vmatprep.mubr.msk.f32.mxu1 %vm72_vm0, %v3901_v56  ;;  %v1932_v60 = vld [vmem:[%s4083_s9] sm:$0xff] }
 0x41d   :  { %v3275_v5 = vpack.c.bf16 %v1933_v55, %v1932_v60 }
 0x41e   :  { %v3909_v22 = vmax.f32 %v1460_v0, 0.0 }
 0x420   :  { %3017 = vmatmul.mubr.msk.f32.gmra.mrb[70].mxu0 %vm72_vm0, %v3909_v22  ;;  %3077 = vmatmul.mubr.msk.f32.gmra.mrb[54].mxu1 %vm72_vm0, %v3909_v22 }
 0x421   :  { %3027 = vmatprep.mubr.msk.f32.mxu0 %vm72_vm0, %v3841_v2  ;;  %2105 = vmatprep.mubr.f32.mxu1 %v3526_v38  ;;  %v1934_v38 = vld [vmem:[%s4083_s9 + $0x10] sm:$0xff] }
 0x422   :  { %v3279_v8 = vpack.c.bf16 %v1935_v6, %v1934_v38 }
 0x424   :  { %3028 = vmatmul.mubr.msk.f32.vlgmr.msra.gmra.mrb[72].mxu0 %vm72_vm0, %v3855_v9 }
 0x425   :  { %3030 = vmatprep.mubr.msk.f32.mxu0 %vm72_vm0, %v3869_v17  ;;  %3262 = vmatpush3.bf16.msra.mxu0 %v3259_v39 }
 0x426   :  { %3264 = vmatprep.subr.bf16.mxu0 %v3263_v21 }
 0x428   :  { %3031 = vmatmul.mubr.msk.f32.gmra.mrb[74].mxu0 %vm72_vm0, %v3877_v43 }
 0x429   :  { %3033 = vmatprep.mubr.msk.f32.mxu0 %vm72_vm0, %v3885_v48  ;;  %3266 = vmatpush3.bf16.msra.mxu0 %v3263_v21 }
 0x42a   :  { %3276 = vmatprep.subr.bf16.mxu0 %v3275_v5 }
 0x42c   :  { %3034 = vmatmul.mubr.msk.f32.gmra.mrb[76].mxu0 %vm72_vm0, %v3893_v53 }
 0x42d   :  { %3036 = vmatprep.mubr.msk.f32.mxu0 %vm72_vm0, %v3901_v56 }
 0x430   :  { %3037 = vmatmul.mubr.msk.f32.gmra.mrb[78].mxu0 %vm72_vm0, %v3909_v22 }
 0x431   :  { %3047 = vmatprep.mubr.msk.f32.mxu0 %vm72_vm0, %v3841_v2 }
 0x434   :  { %3048 = vmatmul.mubr.msk.f32.vlgmr.msra.gmra.mrb[80].mxu0 %vm72_vm0, %v3855_v9 }
 0x435   :  { %3050 = vmatprep.mubr.msk.f32.mxu0 %vm72_vm0, %v3869_v17  ;;  %3278 = vmatpush3.bf16.msra.mxu0 %v3275_v5 }
 0x436   :  { %3280 = vmatprep.subr.bf16.mxu0 %v3279_v8 }
 0x438   :  { %3051 = vmatmul.mubr.msk.f32.gmra.mrb[82].mxu0 %vm72_vm0, %v3877_v43 }
 0x439   :  { %3053 = vmatprep.mubr.msk.f32.mxu0 %vm72_vm0, %v3885_v48  ;;  %3282 = vmatpush3.bf16.msra.mxu0 %v3279_v8 }
 0x43c   :  { %3054 = vmatmul.mubr.msk.f32.gmra.mrb[84].mxu0 %vm72_vm0, %v3893_v53 }
 0x43d   :  { %3056 = vmatprep.mubr.msk.f32.mxu0 %vm72_vm0, %v3901_v56 }
 0x440   :  { %3057 = vmatmul.mubr.msk.f32.gmra.mrb[86].mxu0 %vm72_vm0, %v3909_v22 }
 0x441   :  { %3087 = vmatprep.mubr.msk.f32.mxu0 %vm72_vm0, %v3841_v2 }
 0x444   :  { %3088 = vmatmul.mubr.msk.f32.vlgmr.msra.gmra.mrb[88].mxu0 %vm72_vm0, %v3855_v9 }
 0x445   :  { %3090 = vmatprep.mubr.msk.f32.mxu0 %vm72_vm0, %v3869_v17 }
 0x448   :  { %3091 = vmatmul.mubr.msk.f32.gmra.mrb[90].mxu0 %vm72_vm0, %v3877_v43 }
 0x449   :  { %3093 = vmatprep.mubr.msk.f32.mxu0 %vm72_vm0, %v3885_v48 }
 0x44c   :  { %3094 = vmatmul.mubr.msk.f32.gmra.mrb[92].mxu0 %vm72_vm0, %v3893_v53 }
 0x44d   :  { %3096 = vmatprep.mubr.msk.f32.mxu0 %vm72_vm0, %v3901_v56 }
 0x450   :  { %3097 = vmatmul.mubr.msk.f32.gmra.mrb[94].mxu0 %vm72_vm0, %v3909_v22 }
 0x4db   :  { %v3009_v58 = vpop.f32.mrb[64].mxu0  ;;  %v3069_v57 = vpop.f32.mrb[48].mxu1 }
 0x4dc   :  { %v1563_v1 = vpop.f32.mrb[65].mxu0  ;;  %v1893_v10 = vpop.f32.mrb[49].mxu1 }
 0x4dd   :  { %v3285_v11 = vpack.c.bf16 %v3009_v58, %v1563_v1  ;;  %v3299_v12 = vpack.c.bf16 %v3069_v57, %v1893_v10 }
 0x4e3   :  { %v3012_v13 = vpop.f32.mrb[66].mxu0  ;;  %v3072_v14 = vpop.f32.mrb[50].mxu1 }
 0x4e4   :  { %v1573_v16 = vpop.f32.mrb[67].mxu0  ;;  %v1903_v18 = vpop.f32.mrb[51].mxu1 }
 0x4e5   :  { %v3289_v15 = vpack.c.bf16 %v3012_v13, %v1573_v16  ;;  %v3303_v39 = vpack.c.bf16 %v3072_v14, %v1903_v18 }
 0x4eb   :  { %v3015_v40 = vpop.f32.mrb[68].mxu0  ;;  %v3075_v41 = vpop.f32.mrb[52].mxu1 }
 0x4ec   :  { %v1583_v42 = vpop.f32.mrb[69].mxu0  ;;  %v1913_v44 = vpop.f32.mrb[53].mxu1 }
 0x4ed   :  { %v3293_v45 = vpack.c.bf16 %v3015_v40, %v1583_v42  ;;  %v3307_v7 = vpack.c.bf16 %v3075_v41, %v1913_v44 }
 0x4f3   :  { %v3018_v46 = vpop.f32.mrb[70].mxu0  ;;  %v3078_v47 = vpop.f32.mrb[54].mxu1 }
 0x4f4   :  { %v1593_v49 = vpop.f32.mrb[71].mxu0  ;;  %v1923_v50 = vpop.f32.mrb[55].mxu1 }
 0x4f5   :  { %v3297_v51 = vpack.c.bf16 %v3018_v46, %v1593_v49  ;;  %v3311_v20 = vpack.c.bf16 %v3078_v47, %v1923_v50 }
 0x4f7   :  { %v3029_v52 = vpop.f32.mrb[72].mxu0 }
 0x4f8   :  { %v1673_v54 = vpop.f32.mrb[73].mxu0 }
 0x4f9   :  { %v3301_v59 = vpack.c.bf16 %v3029_v52, %v1673_v54 }
 0x4fb   :  { %v3032_v61 = vpop.f32.mrb[74].mxu0 }
 0x4fc   :  { %v1683_v62 = vpop.f32.mrb[75].mxu0 }
 0x4fd   :  { %v3305_v19 = vpack.c.bf16 %v3032_v61, %v1683_v62 }
 0x4ff   :  { %v3035_v63 = vpop.f32.mrb[76].mxu0 }
 0x500   :  { %v1693_v0 = vpop.f32.mrb[77].mxu0 }
 0x501   :  { %v3309_v3 = vpack.c.bf16 %v3035_v63, %v1693_v0 }
 0x503   :  { %v3038_v4 = vpop.f32.mrb[78].mxu0 }
 0x504   :  { %v1703_v21 = vpop.f32.mrb[79].mxu0 }
 0x505   :  { %v3313_v60 = vpack.c.bf16 %v3038_v4, %v1703_v21 }
 0x507   :  { %v3049_v55 = vpop.f32.mrb[80].mxu0 }
 0x508   :  { %v1783_v5 = vpop.f32.mrb[81].mxu0 }
 0x509   :  { %v3283_v38 = vpack.c.bf16 %v3049_v55, %v1783_v5 }
 0x50b   :  { %v3052_v6 = vpop.f32.mrb[82].mxu0  ;;  %3284 = vmatprep.subr.bf16.mxu1 %v3283_v38 }
 0x50c   :  { %v1793_v8 = vpop.f32.mrb[83].mxu0  ;;  %3286 = vmatpush3.bf16.msra.mxu1 %v3285_v11 }
 0x50d   :  { %v3287_v58 = vpack.c.bf16 %v3052_v6, %v1793_v8 }
 0x50f   :  { %v3055_v57 = vpop.f32.mrb[84].mxu0  ;;  %3288 = vmatprep.subr.bf16.mxu1 %v3287_v58 }
 0x510   :  { %v1803_v1 = vpop.f32.mrb[85].mxu0  ;;  %3290 = vmatpush3.bf16.msra.mxu1 %v3289_v15 }
 0x511   :  { %v3291_v10 = vpack.c.bf16 %v3055_v57, %v1803_v1 }
 0x513   :  { %v3058_v13 = vpop.f32.mrb[86].mxu0  ;;  %3292 = vmatprep.subr.bf16.mxu1 %v3291_v10 }
 0x514   :  { %v1813_v14 = vpop.f32.mrb[87].mxu0  ;;  %3294 = vmatpush3.bf16.msra.mxu1 %v3293_v45 }
 0x515   :  { %v3295_v16 = vpack.c.bf16 %v3058_v13, %v1813_v14 }
 0x517   :  { %v3089_v18 = vpop.f32.mrb[88].mxu0  ;;  %3296 = vmatprep.subr.bf16.mxu1 %v3295_v16 }
 0x518   :  { %v2002_v40 = vpop.f32.mrb[89].mxu0  ;;  %3298 = vmatpush3.bf16.msra.mxu1 %v3297_v51 }
 0x519   :  { %3300 = vmatprep.subr.bf16.mxu1 %v3299_v12 }
 0x51b   :  { %v3092_v41 = vpop.f32.mrb[90].mxu0 }
 0x51c   :  { %v2012_v42 = vpop.f32.mrb[91].mxu0  ;;  %3302 = vmatpush3.bf16.msra.mxu1 %v3301_v59 }
 0x51d   :  { %3304 = vmatprep.subr.bf16.mxu1 %v3303_v39 }
 0x51f   :  { %v3982_v11 = vpop.f32.mrb[92].mxu0 }
 0x520   :  { %v2022_v44 = vpop.f32.mrb[93].mxu0  ;;  %3306 = vmatpush3.bf16.msra.mxu1 %v3305_v19 }
 0x521   :  { %3308 = vmatprep.subr.bf16.mxu1 %v3307_v7 }
 0x523   :  { %v3984_v15 = vpop.f32.mrb[94].mxu0 }
 0x524   :  { %v3986_v46 = vpop.f32.mrb[95].mxu0  ;;  %3310 = vmatpush3.bf16.msra.mxu1 %v3309_v3 }
 0x525   :  { %3312 = vmatprep.subr.bf16.mxu1 %v3311_v20 }
 0x528   :  { %3314 = vmatpush3.bf16.msra.mxu1 %v3313_v60 }
 0x52b   :  { %2106 = vmatmul.mubr.f32.vlgmr.msra.gmra.mrb[56].mxu1 %v3541_v23 }
 0x52c   :  { %2110 = vmatprep.mubr.f32.mxu1 %v3546_v24 }
 0x52f   :  { %2111 = vmatmul.mubr.f32.gmra.mrb[58].mxu1 %v3553_v25 }
 0x530   :  { %2115 = vmatprep.mubr.f32.mxu1 %v3558_v26  ;;  %v2448_v26 = vld [vmem:[%s4084_s10] ss:$0 sm:$0xff] }
 0x533   :  { %2116 = vmatmul.mubr.f32.gmra.mrb[60].mxu1 %v3565_v27 }
 0x534   :  { %2120 = vmatprep.mubr.f32.mxu1 %v3570_v28 }
 0x537   :  { %2121 = vmatmul.mubr.f32.gmra.mrb[62].mxu1 %v3577_v29 }
 0x538   :  { %2125 = vmatprep.mubr.f32.mxu1 %v3582_v30 }
 0x53b   :  { %2126 = vmatmul.mubr.f32.gmra.mrb[64].mxu1 %v3589_v31 }
 0x53c   :  { %2130 = vmatprep.mubr.f32.mxu1 %v3594_v32 }
 0x53f   :  { %2131 = vmatmul.mubr.f32.gmra.mrb[66].mxu1 %v3601_v33 }
 0x540   :  { %2135 = vmatprep.mubr.f32.mxu1 %v3606_v34 }
 0x543   :  { %2136 = vmatmul.mubr.f32.gmra.mrb[68].mxu1 %v3613_v35 }
 0x544   :  { %2140 = vmatprep.mubr.f32.mxu1 %v3618_v36 }
 0x547   :  { %2141 = vmatmul.mubr.f32.gmra.mrb[70].mxu1 %v3625_v37 }
 0x5fe   :  { %v2775_v23 = vpop.f32.mrb[56].mxu1 }
 0x5ff   :  { %v2776_v24 = vpop.f32.mrb[57].mxu1 }
 0x600   :  { %v2777_v25 = vadd.f32 %v2776_v24, %v2775_v23 }
 0x602   :  { %v2108_v27 = vadd.f32 %v2777_v25, %v2002_v40  ;;  %v2778_v28 = vpop.f32.mrb[58].mxu1 }
 0x603   :  { %v2779_v29 = vpop.f32.mrb[59].mxu1 }
 0x604   :  { %v4006_v30 = vadd.f32 %v2448_v26, %v2108_v27  ;;  %v2780_v31 = vadd.f32 %v2779_v29, %v2778_v28 }
 0x606   :  { %v2113_v32 = vadd.f32 %v3089_v18, %v2780_v31  ;;  %v2781_v33 = vpop.f32.mrb[60].mxu1  ;;  %v2161_v35 = vmax.f32 %v4006_v30, 0.0 }
 0x607   :  { %v2782_v34 = vpop.f32.mrb[61].mxu1 }
 0x608   :  { %v2154_v36 = vadd.f32 %v2448_v26, %v2113_v32  ;;  %v2783_v37 = vadd.f32 %v2782_v34, %v2781_v33  ;;  %v2169_v47 = vsel %vm72_vm0, %v2161_v35, 0.0 }
 0x60a   :  { %v2162_v12 = vmax.f32 %v2154_v36, 0.0  ;;  %v2118_v39 = vadd.f32 %v2783_v37, %v2012_v42  ;;  %v2784_v45 = vpop.f32.mrb[62].mxu1 }
 0x60b   :  { %v2785_v7 = vpop.f32.mrb[63].mxu1 }
 0x60c   :  { %v2170_v49 = vsel %vm72_vm0, %v2162_v12, 0.0  ;;  %v2155_v50 = vadd.f32 %v2448_v26, %v2118_v39  ;;  %v2786_v51 = vadd.f32 %v2785_v7, %v2784_v45 }
 0x60d   :  { %v2171_v20 = vadd.f32 %v2170_v49, %v2169_v47 }
 0x60e   :  { %v2163_v52 = vmax.f32 %v2155_v50, 0.0  ;;  %v2123_v54 = vadd.f32 %v3092_v41, %v2786_v51  ;;  %v2787_v59 = vpop.f32.mrb[64].mxu1 }
 0x60f   :  { %v2788_v61 = vpop.f32.mrb[65].mxu1 }
 0x610   :  { %v2172_v62 = vsel %vm72_vm0, %v2163_v52, 0.0  ;;  %v2156_v19 = vadd.f32 %v2448_v26, %v2123_v54  ;;  %v2789_v63 = vadd.f32 %v2788_v61, %v2787_v59 }
 0x611   :  { %v2173_v0 = vadd.f32 %v2172_v62, %v2171_v20 }
 0x612   :  { %v2164_v3 = vmax.f32 %v2156_v19, 0.0  ;;  %v2128_v4 = vadd.f32 %v2789_v63, %v2022_v44  ;;  %v2790_v21 = vpop.f32.mrb[66].mxu1 }
 0x613   :  { %v2791_v60 = vpop.f32.mrb[67].mxu1 }
 0x614   :  { %v2174_v55 = vsel %vm72_vm0, %v2164_v3, 0.0  ;;  %v2157_v5 = vadd.f32 %v2448_v26, %v2128_v4  ;;  %v2792_v38 = vadd.f32 %v2791_v60, %v2790_v21 }
 0x615   :  { %v2175_v6 = vadd.f32 %v2174_v55, %v2173_v0 }
 0x616   :  { %v2165_v8 = vmax.f32 %v2157_v5, 0.0  ;;  %v2133_v58 = vadd.f32 %v3982_v11, %v2792_v38  ;;  %v2793_v57 = vpop.f32.mrb[68].mxu1 }
 0x617   :  { %v2794_v1 = vpop.f32.mrb[69].mxu1 }
 0x618   :  { %v2176_v10 = vsel %vm72_vm0, %v2165_v8, 0.0  ;;  %v2158_v13 = vadd.f32 %v2448_v26, %v2133_v58  ;;  %v2795_v14 = vadd.f32 %v2794_v1, %v2793_v57 }
 0x619   :  { %v2177_v16 = vadd.f32 %v2176_v10, %v2175_v6 }
 0x61a   :  { %v2166_v18 = vmax.f32 %v2158_v13, 0.0  ;;  %v2138_v40 = vadd.f32 %v2795_v14, %v3986_v46  ;;  %v2796_v41 = vpop.f32.mrb[70].mxu1 }
 0x61b   :  { %v2797_v42 = vpop.f32.mrb[71].mxu1 }
 0x61c   :  { %v2178_v44 = vsel %vm72_vm0, %v2166_v18, 0.0  ;;  %v2159_v23 = vadd.f32 %v2448_v26, %v2138_v40  ;;  %v2798_v24 = vadd.f32 %v2797_v42, %v2796_v41 }
 0x61d   :  { %v2179_v25 = vadd.f32 %v2178_v44, %v2177_v16 }
 0x61e   :  { %v2167_v27 = vmax.f32 %v2159_v23, 0.0  ;;  %v2143_v11 = vadd.f32 %v3984_v15, %v2798_v24 }
 0x620   :  { %v2180_v28 = vsel %vm72_vm0, %v2167_v27, 0.0  ;;  %v2160_v29 = vadd.f32 %v2448_v26, %v2143_v11 }
 0x621   :  { %v2181_v30 = vadd.f32 %v2180_v28, %v2179_v25  ;;  %v2449_v25 = vld [vmem:[%s4085_s11] ss:$0 sm:$0xff] }
 0x622   :  { %v2168_v31 = vmax.f32 %v2160_v29, 0.0 }
 0x624   :  { %v2182_v32 = vsel %vm72_vm0, %v2168_v31, 0.0 }
 0x625   :  { %v2183_v33 = vadd.f32 %v2182_v32, %v2181_v30 }
 0x627   :  { %v2184_v34 = vrot.slane %v2183_v33, 4 }
 0x629   :  { %v2185_v46 = vadd.f32 %v2184_v34, %v2183_v33 }
 0x62b   :  { %v2186_v36 = vrot.slane %v2185_v46, 2 }
 0x62d   :  { %v2187_v37 = vadd.f32 %v2186_v36, %v2185_v46 }
 0x62f   :  { %v2188_v39 = vrot.slane %v2187_v37, 1 }
 0x631   :  { %v2189_v45 = vadd.f32 %v2188_v39, %v2187_v37 }
 0x633   :  { %v2191_v7 = vmul.f32 0.015625, %v2189_v45 }
 0x635   :  { %v2192_v47 = vsub.f32 %v2161_v35, %v2191_v7  ;;  %v2193_v49 = vsub.f32 %v2162_v12, %v2191_v7  ;;  %v2194_v50 = vsub.f32 %v2163_v52, %v2191_v7  ;;  %v2195_v51 = vsub.f32 %v2164_v3, %v2191_v7 }
 0x636   :  { %v2196_v15 = vsub.f32 %v2165_v8, %v2191_v7  ;;  %v2197_v20 = vsub.f32 %v2166_v18, %v2191_v7  ;;  %v2198_v54 = vsub.f32 %v2167_v27, %v2191_v7  ;;  %v2199_v26 = vsub.f32 %v2168_v31, %v2191_v7 }
 0x637   :  { %v2200_v59 = vmul.f32 %v2192_v47, %v2192_v47  ;;  %v2201_v61 = vmul.f32 %v2193_v49, %v2193_v49  ;;  %v2202_v62 = vmul.f32 %v2194_v50, %v2194_v50  ;;  %v2203_v19 = vmul.f32 %v2195_v51, %v2195_v51 }
 0x638   :  { %v2204_v21 = vmul.f32 %v2196_v15, %v2196_v15  ;;  %v2205_v12 = vmul.f32 %v2197_v20, %v2197_v20  ;;  %v2206_v55 = vmul.f32 %v2198_v54, %v2198_v54  ;;  %v2207_v6 = vmul.f32 %v2199_v26, %v2199_v26 }
 0x639   :  { %v2208_v63 = vsel %vm72_vm0, %v2200_v59, 0.0  ;;  %v2209_v0 = vsel %vm72_vm0, %v2201_v61, 0.0  ;;  %v2211_v60 = vsel %vm72_vm0, %v2202_v62, 0.0  ;;  %v2213_v52 = vsel %vm72_vm0, %v2203_v19, 0.0  ;;  %v2450_v61 = vld [vmem:[%s4086_s12] ss:$0 sm:$0xff] }
 0x63a   :  { %v2210_v4 = vadd.f32 %v2209_v0, %v2208_v63  ;;  %v2215_v5 = vsel %vm72_vm0, %v2204_v21, 0.0  ;;  %v2217_v8 = vsel %vm72_vm0, %v2205_v12, 0.0  ;;  %v2219_v57 = vsel %vm72_vm0, %v2206_v55, 0.0 }
 0x63b   :  { %v2221_v10 = vsel %vm72_vm0, %v2207_v6, 0.0 }
 0x63c   :  { %v2212_v35 = vadd.f32 %v2211_v60, %v2210_v4 }
 0x63e   :  { %v2214_v3 = vadd.f32 %v2213_v52, %v2212_v35 }
 0x640   :  { %v2216_v38 = vadd.f32 %v2215_v5, %v2214_v3 }
 0x642   :  { %v2218_v58 = vadd.f32 %v2217_v8, %v2216_v38 }
 0x644   :  { %v2220_v1 = vadd.f32 %v2219_v57, %v2218_v58 }
 0x646   :  { %v2222_v13 = vadd.f32 %v2221_v10, %v2220_v1 }
 0x648   :  { %v2223_v14 = vrot.slane %v2222_v13, 4 }
 0x64a   :  { %v2224_v16 = vadd.f32 %v2223_v14, %v2222_v13 }
 0x64c   :  { %v2225_v18 = vrot.slane %v2224_v16, 2 }
 0x64e   :  { %v2226_v40 = vadd.f32 %v2225_v18, %v2224_v16 }
 0x650   :  { %v2227_v41 = vrot.slane %v2226_v40, 1 }
 0x652   :  { %v2228_v42 = vadd.f32 %v2227_v41, %v2226_v40 }
 0x654   :  { %v2229_v44 = vmul.f32 0.015625, %v2228_v42 }
 0x656   :  { %v2230_v23 = vadd.f32 1e-05, %v2229_v44 }
 0x658   :  { %3315 = vrsqrt.f32 %v2230_v23 }
 0x662   :  { %v3316_v24 = vpop.eup %3315 }
 0x663   :  { %v2232_v27 = vmul.f32 %v3316_v24, %v2192_v47  ;;  %v2233_v11 = vmul.f32 %v3316_v24, %v2193_v49  ;;  %v2234_v28 = vmul.f32 %v3316_v24, %v2194_v50  ;;  %v2235_v29 = vmul.f32 %v3316_v24, %v2195_v51 }
 0x664   :  { %v2236_v30 = vmul.f32 %v3316_v24, %v2196_v15  ;;  %v2237_v31 = vmul.f32 %v3316_v24, %v2197_v20  ;;  %v2238_v32 = vmul.f32 %v3316_v24, %v2198_v54  ;;  %v2239_v33 = vmul.f32 %v3316_v24, %v2199_v26 }
 0x665   :  { %v2247_v34 = vmul.f32 %v2449_v25, %v2232_v27  ;;  %v2248_v46 = vmul.f32 %v2449_v25, %v2233_v11  ;;  %v2249_v36 = vmul.f32 %v2449_v25, %v2234_v28  ;;  %v2250_v37 = vmul.f32 %v2449_v25, %v2235_v29 }
 0x666   :  { %v2251_v39 = vmul.f32 %v2449_v25, %v2236_v30  ;;  %v2252_v45 = vmul.f32 %v2449_v25, %v2237_v31  ;;  %v2253_v7 = vmul.f32 %v2449_v25, %v2238_v32  ;;  %v2254_v59 = vmul.f32 %v2449_v25, %v2239_v33 }
 0x667   :  { %v2255_v47 = vadd.f32 %v2247_v34, %v3841_v2  ;;  %v2256_v49 = vadd.f32 %v2248_v46, %v3855_v9  ;;  %v2257_v50 = vadd.f32 %v2249_v36, %v3869_v17  ;;  %v2258_v51 = vadd.f32 %v2250_v37, %v3877_v43 }
 0x668   :  { %v2259_v15 = vadd.f32 %v2251_v39, %v3885_v48  ;;  %v2260_v20 = vadd.f32 %v2252_v45, %v3893_v53  ;;  %v2261_v54 = vadd.f32 %v2253_v7, %v3901_v56  ;;  %v2262_v26 = vadd.f32 %v2254_v59, %v3909_v22 }
 0x669   :  { %v2270_v62 = vadd.f32 %v2450_v61, %v2255_v47  ;;  %v2271_v19 = vadd.f32 %v2450_v61, %v2256_v49  ;;  %v2272_v63 = vadd.f32 %v2450_v61, %v2257_v50  ;;  %v2273_v0 = vadd.f32 %v2450_v61, %v2258_v51 }
 0x66a   :  { %v2274_v4 = vadd.f32 %v2450_v61, %v2259_v15  ;;  %v2275_v2 = vadd.f32 %v2450_v61, %v2260_v20  ;;  %v2276_v21 = vadd.f32 %v2450_v61, %v2261_v54  ;;  %v2277_v9 = vadd.f32 %v2450_v61, %v2262_v26 }
 0x66b   :  { %2278 = vst.msk [vmem:[%s4087_s13] sm:$0xff] %vm72_vm0, %v2270_v62  ;;  %2279 = vst.msk [vmem:[%s4087_s13 + $0x8] sm:$0xff] %vm72_vm0, %v2271_v19 }
 0x66c   :  { %2280 = vst.msk [vmem:[%s4087_s13 + $0x10] sm:$0xff] %vm72_vm0, %v2272_v63  ;;  %2281 = vst.msk [vmem:[%s4087_s13 + $0x18] sm:$0xff] %vm72_vm0, %v2273_v0 }
 0x66d   :  { %2282 = vst.msk [vmem:[%s4087_s13 + $0x20] sm:$0xff] %vm72_vm0, %v2274_v4  ;;  %2283 = vst.msk [vmem:[%s4087_s13 + $0x28] sm:$0xff] %vm72_vm0, %v2275_v2 }
 0x66e   :  { %2284 = vst.msk [vmem:[%s4087_s13 + $0x30] sm:$0xff] %vm72_vm0, %v2276_v21  ;;  %2285 = vst.msk [vmem:[%s4087_s13 + $0x38] sm:$0xff] %vm72_vm0, %v2277_v9 }

</bundles_post_ra>
